<compile_context>
chip_gen: v7x
topology: tpu7x:2x2x1
jax: 0.10.0
libtpu: 0.0.40
codegen_flags: <defaults>
</compile_context>

<pallas_src>
import functools

import jax
import jax.numpy as jnp
import numpy as np
from jax.experimental import pallas as pl
from jax.experimental.pallas import tpu as pltpu


def _correlation_kernel(x1_ref, x2_ref, mask_ref, out_ref, acc_ref, *,
                        search_range, W):
    """Per (batch, channel-block) step.

    x1_ref/x2_ref: (1, Cb, H*W) VMEM tiles (input dtype)
    mask_ref:      (D_pad, H*W) f32 scale mask (1/alpha on valid cells, else 0)
    out_ref:       (1, D_pad, H*W) VMEM tile
    acc_ref:       (D_pad, H*W) f32 accumulator scratch (persists across steps)
    """
    D_valid = (2 * search_range + 1) ** 2
    D_pad, HW = acc_ref.shape
    c_idx = pl.program_id(1)

    @pl.when(c_idx == 0)
    def _init():
        acc_ref[...] = jnp.zeros_like(acc_ref)

    # Hoist the f32 upconversion of x1 (one pass; on v5e the VPU has no bf16
    # ALUs, so otherwise every displacement re-converts the x1 slab).
    x1 = x1_ref[0].astype(jnp.float32)      # (Cb, HW)
    x2 = x2_ref[0]                          # (Cb, HW) native dtype for rolls

    # Displacement channel index d reproduces PyTorch's negative-index wrap:
    # d = ((2r+1)*i + j) mod D.  Map d back to (i, j) at trace time.
    side = 2 * search_range + 1
    d_to_ij = {}
    for i in range(-search_range, search_range + 1):
        for j in range(-search_range, search_range + 1):
            d_to_ij[(side * i + j) % D_valid] = (i, j)

    # Sublane-aligned group accumulation: 8 displacement planes at a time,
    # added as one (8, HW) slab into an aligned accumulator stripe.
    zero_plane = jnp.zeros((HW,), jnp.float32)
    for g in range(D_pad // 8):
        planes = []
        for d in range(8 * g, 8 * g + 8):
            if d >= D_valid:
                planes.append(zero_plane)        # pad rows stay exactly 0
                continue
            i, j = d_to_ij[d]
            shift = (i * W + j) % HW             # flat (H, W) roll
            x2s = pltpu.roll(x2, shift=shift, axis=1) if shift else x2
            # similarity metric; product in f32 so bf16 inputs reduce in f32.
            # TODO(synk): a jnp.dot(ones(1, Cb), prod) MXU reduce could off-load
            # the XLU further; verify against a bundle dump before switching.
            planes.append(jnp.sum(x1 * x2s.astype(jnp.float32), axis=0))
        idx = pl.ds(8 * g, 8)
        acc_ref[idx, :] = acc_ref[idx, :] + jnp.stack(planes, axis=0)

    @pl.when(c_idx == pl.num_programs(1) - 1)
    def _finalize():
        # Scale mask zeroes rolled-in wrap-around border cells (logit exactly 0
        # before the softmax, as in the PyTorch loop) and applies 1/alpha.
        logits = acc_ref[...] * mask_ref[...]
        # Exclude pad rows (D_valid..D_pad) from the softmax additively.
        row = jax.lax.broadcasted_iota(jnp.int32, (D_pad, HW), 0)
        logits = jnp.where(row < D_valid, logits, -1e30)
        m = jnp.max(logits, axis=0, keepdims=True)
        e = jnp.exp(logits - m)
        s = jnp.sum(e, axis=0, keepdims=True)
        # Epilogue runs once per batch -> exact divide is essentially free.
        out_ref[0] = (e / s).astype(out_ref.dtype)


def _scale_mask(search_range, H, W, alpha, d_pad):
    """Host (D_pad, H*W) f32 mask: 1/alpha on valid cells, 0 on borders/pad rows."""
    D = (2 * search_range + 1) ** 2
    m = np.zeros((d_pad, H, W), np.float32)
    for i in range(-search_range, search_range + 1):
        for j in range(-search_range, search_range + 1):
            d = ((2 * search_range + 1) * i + j) % D
            m[d, max(i, 0):H + min(i, 0), max(j, 0):W + min(j, 0)] = 1.0
    return (m / float(alpha)).reshape(d_pad, H * W)


def _vmem_capacity_bytes():
    """Per-TensorCore VMEM capacity; conservative (v7x) fallback."""
    try:
        return int(pltpu.get_tpu_info().vmem_capacity_bytes)
    except Exception:
        return 64 << 20


def _pick_c_block(C, HW, itemsize, input_budget_bytes):
    """Largest channel block (whole C, else a multiple of 8) whose two
    double-buffered input tiles fit input_budget_bytes."""
    per_chan = 4 * HW * itemsize           # x1 + x2, each double-buffered
    cap = max(1, input_budget_bytes // per_chan)
    if cap >= C:
        return C                           # whole-C tile, num_c == 1
    return max(8, (cap // 8) * 8)


def correlation_layer(x1, x2, search_range, alpha=1.0, c_block=None):
    """Pallas equivalent of CorrelationLayer.forward(x1, x2, alpha=alpha)."""
    B, C, H, W = x1.shape
    D = (2 * search_range + 1) ** 2
    D_pad = ((D + 7) // 8) * 8
    HW = H * W
    itemsize = x1.dtype.itemsize

    # Generation-aware VMEM budgeting (v7x: 64 MiB -> scoped cap ~48 MiB;
    # v5e/v6e: 128 MiB -> ~96 MiB), leaving headroom for Mosaic scratch.
    vmem_cap = _vmem_capacity_bytes()
    scoped_cap = (vmem_cap * 3) // 4
    fixed_bytes = (2 * D_pad * HW * 4            # scale mask (double-buffered)
                   + 2 * D_pad * HW * itemsize   # resident output (double-buffered)
                   + D_pad * HW * 4)             # f32 accumulator scratch
    input_budget = max(4 << 20, scoped_cap - fixed_bytes - (2 << 20))

    if c_block is None:
        c_block = _pick_c_block(C, HW, itemsize, input_budget)
    if c_block >= C:
        c_block = C                              # whole-C block (full-dim tile)
    else:
        c_block = max(8, (c_block // 8) * 8)     # keep sublane dim 8-aligned
    C_pad = ((C + c_block - 1) // c_block) * c_block
    num_c = C_pad // c_block

    # Lane-dense layout: flatten (H, W) -> H*W so the last dim fills vreg lanes.
    x1f = x1.reshape(B, C, HW)
    x2f = x2.reshape(B, C, HW)
    if C_pad != C:                               # zero channels contribute 0
        pad = [(0, 0), (0, C_pad - C), (0, 0)]
        x1f = jnp.pad(x1f, pad)
        x2f = jnp.pad(x2f, pad)
    mask = jnp.asarray(_scale_mask(search_range, H, W, alpha, D_pad))

    # Exact per-call VMEM need (+ margin), capped at the scoped budget.
    need = 4 * c_block * HW * itemsize + fixed_bytes
    vmem_limit = int(min(max(need + (2 << 20), 16 << 20), scoped_cap))

    kernel = functools.partial(_correlation_kernel,
                               search_range=search_range, W=W)

    out_flat = pl.pallas_call(
        kernel,
        out_shape=jax.ShapeDtypeStruct((B, D_pad, HW), x1.dtype),
        grid=(B, num_c),
        in_specs=[
            pl.BlockSpec((1, c_block, HW), lambda b, c: (b, c, 0)),
            pl.BlockSpec((1, c_block, HW), lambda b, c: (b, c, 0)),
            # Constant 32 KiB block; default double-buffering kept for
            # robustness (pl.Buffered(1) would only save one small buffer).
            pl.BlockSpec((D_pad, HW), lambda b, c: (0, 0)),
        ],
        out_specs=pl.BlockSpec((1, D_pad, HW), lambda b, c: (b, 0, 0)),
        scratch_shapes=[pltpu.VMEM((D_pad, HW), jnp.float32)],
        compiler_params=pltpu.CompilerParams(
            dimension_semantics=("parallel", "arbitrary"),
            vmem_limit_bytes=vmem_limit,
        ),
    )(x1f, x2f, mask)

    # Strip the pad displacement rows and restore the (B, D, H, W) layout.
    return out_flat[:, :D, :].reshape(B, D, H, W)


def correlation_ref(x1, x2, search_range, alpha=1.0):
    """Pure-JAX reference mirroring the PyTorch loop exactly."""
    B, C, H, W = x1.shape
    D = (2 * search_range + 1) ** 2
    cv = jnp.zeros((B, D, H, W), jnp.float32)
    for i in range(-search_range, search_range + 1):
        for j in range(-search_range, search_range + 1):
            d = ((2 * search_range + 1) * i + j) % D
            sh = slice(max(i, 0), H + min(i, 0))
            sw = slice(max(j, 0), W + min(j, 0))
            shr = slice(max(-i, 0), H + min(-i, 0))
            swr = slice(max(-j, 0), W + min(-j, 0))
            val = jnp.sum(x1[:, :, sh, sw] * x2[:, :, shr, swr], axis=1)
            cv = cv.at[:, d, sh, sw].set(val)
    return jax.nn.softmax(cv / alpha, axis=1)


if __name__ == "__main__":
    key = jax.random.PRNGKey(0)
    k1, k2, k3, k4 = jax.random.split(key, 4)

    B, C, H, W = 2, 4, 16, 16
    search_range = 2  # D = 25 -> padded to 32 inside the kernel

    x1 = jax.random.normal(k1, (B, C, H, W), jnp.float32)
    x2 = jax.random.normal(k2, (B, C, H, W), jnp.float32)

    out = jax.block_until_ready(correlation_layer(x1, x2, search_range, alpha=1.0))
    assert out.shape == (B, (2 * search_range + 1) ** 2, H, W)

    ref = correlation_ref(x1, x2, search_range, alpha=1.0)
    np.testing.assert_allclose(np.asarray(out), np.asarray(ref),
                               rtol=1e-4, atol=1e-5)

    # Channel-blocked reduction path (C grid axis, 2 steps).
    C2 = 16
    y1 = jax.random.normal(k3, (B, C2, H, W), jnp.float32)
    y2 = jax.random.normal(k4, (B, C2, H, W), jnp.float32)
    out2 = jax.block_until_ready(
        correlation_layer(y1, y2, search_range, alpha=2.0, c_block=8))
    ref2 = correlation_ref(y1, y2, search_range, alpha=2.0)
    np.testing.assert_allclose(np.asarray(out2), np.asarray(ref2),
                               rtol=1e-4, atol=1e-5)

    # Awkward C (not a multiple of the block): zero-padded-channels path.
    C3 = 12
    z1 = jax.random.normal(k3, (B, C3, H, W), jnp.float32)
    z2 = jax.random.normal(k4, (B, C3, H, W), jnp.float32)
    out3 = jax.block_until_ready(
        correlation_layer(z1, z2, search_range, alpha=1.0, c_block=8))
    ref3 = correlation_ref(z1, z2, search_range, alpha=1.0)
    np.testing.assert_allclose(np.asarray(out3), np.asarray(ref3),
                               rtol=1e-4, atol=1e-5)

    print("KERNEL_OK")
</pallas_src>

<mosaic_0001>
module attributes {stable_mosaic.version = 11 : i64} {
  func.func @_correlation_kernel(%arg0: i32, %arg1: i32, %arg2: memref<1x4x256xf32, #tpu.memory_space<vmem>>, %arg3: memref<1x4x256xf32, #tpu.memory_space<vmem>>, %arg4: memref<32x256xf32, #tpu.memory_space<vmem>>, %arg5: memref<1x32x256xf32, #tpu.memory_space<vmem>>, %arg6: memref<32x256xf32, #tpu.memory_space<vmem>>) attributes {dimension_semantics = [#tpu.dimension_semantics<parallel>, #tpu.dimension_semantics<arbitrary>], iteration_bounds = array<i64: 2, 1>, scalar_prefetch = 0 : i64, scratch_operands = 1 : i64, tpu.core_type = #tpu.core_type<tc>, window_params = [{transform_indices = @transform_0, window_bounds = array<i64: 1, 4, 256>}, {transform_indices = @transform_1, window_bounds = array<i64: 1, 4, 256>}, {pipeline_mode = #tpu.pipeline_mode<synchronous>, transform_indices = @transform_2, window_bounds = array<i64: 32, 256>}, {transform_indices = @transform_3, window_bounds = array<i64: 1, 32, 256>}]} {
    %c0_i32 = arith.constant 0 : i32
    %0 = arith.cmpi eq, %arg1, %c0_i32 : i32
    %1 = arith.extui %0 : i1 to i32
    %c0_i32_0 = arith.constant 0 : i32
    %2 = arith.cmpi ne, %1, %c0_i32_0 : i32
    scf.if %2 {
      %cst_46 = arith.constant 0.000000e+00 : f32
      %133 = vector.broadcast %cst_46 : f32 to vector<32x256xf32>
      %c0_47 = arith.constant 0 : index
      %c0_48 = arith.constant 0 : index
      %134 = vector.load %arg6[%c0_47, %c0_48] : memref<32x256xf32, #tpu.memory_space<vmem>>, vector<32x256xf32>
      tpu.vector_store %arg6[%c0_47, %c0_48], %133 {strides = array<i32>} : memref<32x256xf32, #tpu.memory_space<vmem>>, vector<32x256xf32>,
    } else {
    }
    %c0 = arith.constant 0 : index
    %c0_1 = arith.constant 0 : index
    %c0_2 = arith.constant 0 : index
    %3 = vector.load %arg2[%c0, %c0_1, %c0_2] : memref<1x4x256xf32, #tpu.memory_space<vmem>>, vector<1x4x256xf32>
    %4 = vector.shape_cast %3 : vector<1x4x256xf32> to vector<4x256xf32>
    %c0_3 = arith.constant 0 : index
    %c0_4 = arith.constant 0 : index
    %c0_5 = arith.constant 0 : index
    %5 = vector.load %arg3[%c0_3, %c0_4, %c0_5] : memref<1x4x256xf32, #tpu.memory_space<vmem>>, vector<1x4x256xf32>
    %6 = vector.shape_cast %5 : vector<1x4x256xf32> to vector<4x256xf32>
    %cst = arith.constant 0.000000e+00 : f32
    %7 = vector.broadcast %cst : f32 to vector<256xf32>
    %8 = arith.mulf %4, %6 : vector<4x256xf32>
    %cst_6 = arith.constant dense<0.000000e+00> : vector<256xf32>
    %9 = vector.multi_reduction <add>, %8, %cst_6 [0] : vector<4x256xf32> to vector<256xf32>
    %c1_i32 = arith.constant 1 : i32
    %10 = tpu.dynamic_rotate %6 by %c1_i32 dim 1 : vector<4x256xf32>, i32 -> vector<4x256xf32>
    %11 = arith.mulf %4, %10 : vector<4x256xf32>
    %cst_7 = arith.constant dense<0.000000e+00> : vector<256xf32>
    %12 = vector.multi_reduction <add>, %11, %cst_7 [0] : vector<4x256xf32> to vector<256xf32>
    %c2_i32 = arith.constant 2 : i32
    %13 = tpu.dynamic_rotate %6 by %c2_i32 dim 1 : vector<4x256xf32>, i32 -> vector<4x256xf32>
    %14 = arith.mulf %4, %13 : vector<4x256xf32>
    %cst_8 = arith.constant dense<0.000000e+00> : vector<256xf32>
    %15 = vector.multi_reduction <add>, %14, %cst_8 [0] : vector<4x256xf32> to vector<256xf32>
    %c14_i32 = arith.constant 14 : i32
    %16 = tpu.dynamic_rotate %6 by %c14_i32 dim 1 : vector<4x256xf32>, i32 -> vector<4x256xf32>
    %17 = arith.mulf %4, %16 : vector<4x256xf32>
    %cst_9 = arith.constant dense<0.000000e+00> : vector<256xf32>
    %18 = vector.multi_reduction <add>, %17, %cst_9 [0] : vector<4x256xf32> to vector<256xf32>
    %c15_i32 = arith.constant 15 : i32
    %19 = tpu.dynamic_rotate %6 by %c15_i32 dim 1 : vector<4x256xf32>, i32 -> vector<4x256xf32>
    %20 = arith.mulf %4, %19 : vector<4x256xf32>
    %cst_10 = arith.constant dense<0.000000e+00> : vector<256xf32>
    %21 = vector.multi_reduction <add>, %20, %cst_10 [0] : vector<4x256xf32> to vector<256xf32>
    %c16_i32 = arith.constant 16 : i32
    %22 = tpu.dynamic_rotate %6 by %c16_i32 dim 1 : vector<4x256xf32>, i32 -> vector<4x256xf32>
    %23 = arith.mulf %4, %22 : vector<4x256xf32>
    %cst_11 = arith.constant dense<0.000000e+00> : vector<256xf32>
    %24 = vector.multi_reduction <add>, %23, %cst_11 [0] : vector<4x256xf32> to vector<256xf32>
    %c17_i32 = arith.constant 17 : i32
    %25 = tpu.dynamic_rotate %6 by %c17_i32 dim 1 : vector<4x256xf32>, i32 -> vector<4x256xf32>
    %26 = arith.mulf %4, %25 : vector<4x256xf32>
    %cst_12 = arith.constant dense<0.000000e+00> : vector<256xf32>
    %27 = vector.multi_reduction <add>, %26, %cst_12 [0] : vector<4x256xf32> to vector<256xf32>
    %c18_i32 = arith.constant 18 : i32
    %28 = tpu.dynamic_rotate %6 by %c18_i32 dim 1 : vector<4x256xf32>, i32 -> vector<4x256xf32>
    %29 = arith.mulf %4, %28 : vector<4x256xf32>
    %cst_13 = arith.constant dense<0.000000e+00> : vector<256xf32>
    %30 = vector.multi_reduction <add>, %29, %cst_13 [0] : vector<4x256xf32> to vector<256xf32>
    %c0_14 = arith.constant 0 : index
    %c0_15 = arith.constant 0 : index
    %31 = vector.load %arg6[%c0_14, %c0_15] : memref<32x256xf32, #tpu.memory_space<vmem>>, vector<8x256xf32>
    %32 = vector.shape_cast %9 : vector<256xf32> to vector<1x256xf32>
    %33 = vector.shape_cast %12 : vector<256xf32> to vector<1x256xf32>
    %34 = vector.shape_cast %15 : vector<256xf32> to vector<1x256xf32>
    %35 = vector.shape_cast %18 : vector<256xf32> to vector<1x256xf32>
    %36 = vector.shape_cast %21 : vector<256xf32> to vector<1x256xf32>
    %37 = vector.shape_cast %24 : vector<256xf32> to vector<1x256xf32>
    %38 = vector.shape_cast %27 : vector<256xf32> to vector<1x256xf32>
    %39 = vector.shape_cast %30 : vector<256xf32> to vector<1x256xf32>
    %40 = tpu.concatenate %32, %33, %34, %35, %36, %37, %38, %39 in 0 : vector<1x256xf32>, vector<1x256xf32>, vector<1x256xf32>, vector<1x256xf32>, vector<1x256xf32>, vector<1x256xf32>, vector<1x256xf32>, vector<1x256xf32> -> vector<8x256xf32>
    %41 = arith.addf %31, %40 : vector<8x256xf32>
    %c0_16 = arith.constant 0 : index
    %c0_17 = arith.constant 0 : index
    %42 = vector.load %arg6[%c0_16, %c0_17] : memref<32x256xf32, #tpu.memory_space<vmem>>, vector<8x256xf32>
    tpu.vector_store %arg6[%c0_16, %c0_17], %41 {strides = array<i32>} : memref<32x256xf32, #tpu.memory_space<vmem>>, vector<8x256xf32>,
    %c30_i32 = arith.constant 30 : i32
    %43 = tpu.dynamic_rotate %6 by %c30_i32 dim 1 : vector<4x256xf32>, i32 -> vector<4x256xf32>
    %44 = arith.mulf %4, %43 : vector<4x256xf32>
    %cst_18 = arith.constant dense<0.000000e+00> : vector<256xf32>
    %45 = vector.multi_reduction <add>, %44, %cst_18 [0] : vector<4x256xf32> to vector<256xf32>
    %c31_i32 = arith.constant 31 : i32
    %46 = tpu.dynamic_rotate %6 by %c31_i32 dim 1 : vector<4x256xf32>, i32 -> vector<4x256xf32>
    %47 = arith.mulf %4, %46 : vector<4x256xf32>
    %cst_19 = arith.constant dense<0.000000e+00> : vector<256xf32>
    %48 = vector.multi_reduction <add>, %47, %cst_19 [0] : vector<4x256xf32> to vector<256xf32>
    %c32_i32 = arith.constant 32 : i32
    %49 = tpu.dynamic_rotate %6 by %c32_i32 dim 1 : vector<4x256xf32>, i32 -> vector<4x256xf32>
    %50 = arith.mulf %4, %49 : vector<4x256xf32>
    %cst_20 = arith.constant dense<0.000000e+00> : vector<256xf32>
    %51 = vector.multi_reduction <add>, %50, %cst_20 [0] : vector<4x256xf32> to vector<256xf32>
    %c33_i32 = arith.constant 33 : i32
    %52 = tpu.dynamic_rotate %6 by %c33_i32 dim 1 : vector<4x256xf32>, i32 -> vector<4x256xf32>
    %53 = arith.mulf %4, %52 : vector<4x256xf32>
    %cst_21 = arith.constant dense<0.000000e+00> : vector<256xf32>
    %54 = vector.multi_reduction <add>, %53, %cst_21 [0] : vector<4x256xf32> to vector<256xf32>
    %c34_i32 = arith.constant 34 : i32
    %55 = tpu.dynamic_rotate %6 by %c34_i32 dim 1 : vector<4x256xf32>, i32 -> vector<4x256xf32>
    %56 = arith.mulf %4, %55 : vector<4x256xf32>
    %cst_22 = arith.constant dense<0.000000e+00> : vector<256xf32>
    %57 = vector.multi_reduction <add>, %56, %cst_22 [0] : vector<4x256xf32> to vector<256xf32>
    %c222_i32 = arith.constant 222 : i32
    %58 = tpu.dynamic_rotate %6 by %c222_i32 dim 1 : vector<4x256xf32>, i32 -> vector<4x256xf32>
    %59 = arith.mulf %4, %58 : vector<4x256xf32>
    %cst_23 = arith.constant dense<0.000000e+00> : vector<256xf32>
    %60 = vector.multi_reduction <add>, %59, %cst_23 [0] : vector<4x256xf32> to vector<256xf32>
    %c223_i32 = arith.constant 223 : i32
    %61 = tpu.dynamic_rotate %6 by %c223_i32 dim 1 : vector<4x256xf32>, i32 -> vector<4x256xf32>
    %62 = arith.mulf %4, %61 : vector<4x256xf32>
    %cst_24 = arith.constant dense<0.000000e+00> : vector<256xf32>
    %63 = vector.multi_reduction <add>, %62, %cst_24 [0] : vector<4x256xf32> to vector<256xf32>
    %c224_i32 = arith.constant 224 : i32
    %64 = tpu.dynamic_rotate %6 by %c224_i32 dim 1 : vector<4x256xf32>, i32 -> vector<4x256xf32>
    %65 = arith.mulf %4, %64 : vector<4x256xf32>
    %cst_25 = arith.constant dense<0.000000e+00> : vector<256xf32>
    %66 = vector.multi_reduction <add>, %65, %cst_25 [0] : vector<4x256xf32> to vector<256xf32>
    %c8 = arith.constant 8 : index
    %c0_26 = arith.constant 0 : index
    %67 = vector.load %arg6[%c8, %c0_26] : memref<32x256xf32, #tpu.memory_space<vmem>>, vector<8x256xf32>
    %68 = vector.shape_cast %45 : vector<256xf32> to vector<1x256xf32>
    %69 = vector.shape_cast %48 : vector<256xf32> to vector<1x256xf32>
    %70 = vector.shape_cast %51 : vector<256xf32> to vector<1x256xf32>
    %71 = vector.shape_cast %54 : vector<256xf32> to vector<1x256xf32>
    %72 = vector.shape_cast %57 : vector<256xf32> to vector<1x256xf32>
    %73 = vector.shape_cast %60 : vector<256xf32> to vector<1x256xf32>
    %74 = vector.shape_cast %63 : vector<256xf32> to vector<1x256xf32>
    %75 = vector.shape_cast %66 : vector<256xf32> to vector<1x256xf32>
    %76 = tpu.concatenate %68, %69, %70, %71, %72, %73, %74, %75 in 0 : vector<1x256xf32>, vector<1x256xf32>, vector<1x256xf32>, vector<1x256xf32>, vector<1x256xf32>, vector<1x256xf32>, vector<1x256xf32>, vector<1x256xf32> -> vector<8x256xf32>
    %77 = arith.addf %67, %76 : vector<8x256xf32>
    %c8_27 = arith.constant 8 : index
    %c0_28 = arith.constant 0 : index
    %78 = vector.load %arg6[%c8_27, %c0_28] : memref<32x256xf32, #tpu.memory_space<vmem>>, vector<8x256xf32>
    tpu.vector_store %arg6[%c8_27, %c0_28], %77 {strides = array<i32>} : memref<32x256xf32, #tpu.memory_space<vmem>>, vector<8x256xf32>,
    %c225_i32 = arith.constant 225 : i32
    %79 = tpu.dynamic_rotate %6 by %c225_i32 dim 1 : vector<4x256xf32>, i32 -> vector<4x256xf32>
    %80 = arith.mulf %4, %79 : vector<4x256xf32>
    %cst_29 = arith.constant dense<0.000000e+00> : vector<256xf32>
    %81 = vector.multi_reduction <add>, %80, %cst_29 [0] : vector<4x256xf32> to vector<256xf32>
    %c226_i32 = arith.constant 226 : i32
    %82 = tpu.dynamic_rotate %6 by %c226_i32 dim 1 : vector<4x256xf32>, i32 -> vector<4x256xf32>
    %83 = arith.mulf %4, %82 : vector<4x256xf32>
    %cst_30 = arith.constant dense<0.000000e+00> : vector<256xf32>
    %84 = vector.multi_reduction <add>, %83, %cst_30 [0] : vector<4x256xf32> to vector<256xf32>
    %c238_i32 = arith.constant 238 : i32
    %85 = tpu.dynamic_rotate %6 by %c238_i32 dim 1 : vector<4x256xf32>, i32 -> vector<4x256xf32>
    %86 = arith.mulf %4, %85 : vector<4x256xf32>
    %cst_31 = arith.constant dense<0.000000e+00> : vector<256xf32>
    %87 = vector.multi_reduction <add>, %86, %cst_31 [0] : vector<4x256xf32> to vector<256xf32>
    %c239_i32 = arith.constant 239 : i32
    %88 = tpu.dynamic_rotate %6 by %c239_i32 dim 1 : vector<4x256xf32>, i32 -> vector<4x256xf32>
    %89 = arith.mulf %4, %88 : vector<4x256xf32>
    %cst_32 = arith.constant dense<0.000000e+00> : vector<256xf32>
    %90 = vector.multi_reduction <add>, %89, %cst_32 [0] : vector<4x256xf32> to vector<256xf32>
    %c240_i32 = arith.constant 240 : i32
    %91 = tpu.dynamic_rotate %6 by %c240_i32 dim 1 : vector<4x256xf32>, i32 -> vector<4x256xf32>
    %92 = arith.mulf %4, %91 : vector<4x256xf32>
    %cst_33 = arith.constant dense<0.000000e+00> : vector<256xf32>
    %93 = vector.multi_reduction <add>, %92, %cst_33 [0] : vector<4x256xf32> to vector<256xf32>
    %c241_i32 = arith.constant 241 : i32
    %94 = tpu.dynamic_rotate %6 by %c241_i32 dim 1 : vector<4x256xf32>, i32 -> vector<4x256xf32>
    %95 = arith.mulf %4, %94 : vector<4x256xf32>
    %cst_34 = arith.constant dense<0.000000e+00> : vector<256xf32>
    %96 = vector.multi_reduction <add>, %95, %cst_34 [0] : vector<4x256xf32> to vector<256xf32>
    %c242_i32 = arith.constant 242 : i32
    %97 = tpu.dynamic_rotate %6 by %c242_i32 dim 1 : vector<4x256xf32>, i32 -> vector<4x256xf32>
    %98 = arith.mulf %4, %97 : vector<4x256xf32>
    %cst_35 = arith.constant dense<0.000000e+00> : vector<256xf32>
    %99 = vector.multi_reduction <add>, %98, %cst_35 [0] : vector<4x256xf32> to vector<256xf32>
    %c254_i32 = arith.constant 254 : i32
    %100 = tpu.dynamic_rotate %6 by %c254_i32 dim 1 : vector<4x256xf32>, i32 -> vector<4x256xf32>
    %101 = arith.mulf %4, %100 : vector<4x256xf32>
    %cst_36 = arith.constant dense<0.000000e+00> : vector<256xf32>
    %102 = vector.multi_reduction <add>, %101, %cst_36 [0] : vector<4x256xf32> to vector<256xf32>
    %c16 = arith.constant 16 : index
    %c0_37 = arith.constant 0 : index
    %103 = vector.load %arg6[%c16, %c0_37] : memref<32x256xf32, #tpu.memory_space<vmem>>, vector<8x256xf32>
    %104 = vector.shape_cast %81 : vector<256xf32> to vector<1x256xf32>
    %105 = vector.shape_cast %84 : vector<256xf32> to vector<1x256xf32>
    %106 = vector.shape_cast %87 : vector<256xf32> to vector<1x256xf32>
    %107 = vector.shape_cast %90 : vector<256xf32> to vector<1x256xf32>
    %108 = vector.shape_cast %93 : vector<256xf32> to vector<1x256xf32>
    %109 = vector.shape_cast %96 : vector<256xf32> to vector<1x256xf32>
    %110 = vector.shape_cast %99 : vector<256xf32> to vector<1x256xf32>
    %111 = vector.shape_cast %102 : vector<256xf32> to vector<1x256xf32>
    %112 = tpu.concatenate %104, %105, %106, %107, %108, %109, %110, %111 in 0 : vector<1x256xf32>, vector<1x256xf32>, vector<1x256xf32>, vector<1x256xf32>, vector<1x256xf32>, vector<1x256xf32>, vector<1x256xf32>, vector<1x256xf32> -> vector<8x256xf32>
    %113 = arith.addf %103, %112 : vector<8x256xf32>
    %c16_38 = arith.constant 16 : index
    %c0_39 = arith.constant 0 : index
    %114 = vector.load %arg6[%c16_38, %c0_39] : memref<32x256xf32, #tpu.memory_space<vmem>>, vector<8x256xf32>
    tpu.vector_store %arg6[%c16_38, %c0_39], %113 {strides = array<i32>} : memref<32x256xf32, #tpu.memory_space<vmem>>, vector<8x256xf32>,
    %c255_i32 = arith.constant 255 : i32
    %115 = tpu.dynamic_rotate %6 by %c255_i32 dim 1 : vector<4x256xf32>, i32 -> vector<4x256xf32>
    %116 = arith.mulf %4, %115 : vector<4x256xf32>
    %cst_40 = arith.constant dense<0.000000e+00> : vector<256xf32>
    %117 = vector.multi_reduction <add>, %116, %cst_40 [0] : vector<4x256xf32> to vector<256xf32>
    %c24 = arith.constant 24 : index
    %c0_41 = arith.constant 0 : index
    %118 = vector.load %arg6[%c24, %c0_41] : memref<32x256xf32, #tpu.memory_space<vmem>>, vector<8x256xf32>
    %119 = vector.shape_cast %117 : vector<256xf32> to vector<1x256xf32>
    %120 = vector.shape_cast %7 : vector<256xf32> to vector<1x256xf32>
    %121 = vector.shape_cast %7 : vector<256xf32> to vector<1x256xf32>
    %122 = vector.shape_cast %7 : vector<256xf32> to vector<1x256xf32>
    %123 = vector.shape_cast %7 : vector<256xf32> to vector<1x256xf32>
    %124 = vector.shape_cast %7 : vector<256xf32> to vector<1x256xf32>
    %125 = vector.shape_cast %7 : vector<256xf32> to vector<1x256xf32>
    %126 = vector.shape_cast %7 : vector<256xf32> to vector<1x256xf32>
    %127 = tpu.concatenate %119, %120, %121, %122, %123, %124, %125, %126 in 0 : vector<1x256xf32>, vector<1x256xf32>, vector<1x256xf32>, vector<1x256xf32>, vector<1x256xf32>, vector<1x256xf32>, vector<1x256xf32>, vector<1x256xf32> -> vector<8x256xf32>
    %128 = arith.addf %118, %127 : vector<8x256xf32>
    %c24_42 = arith.constant 24 : index
    %c0_43 = arith.constant 0 : index
    %129 = vector.load %arg6[%c24_42, %c0_43] : memref<32x256xf32, #tpu.memory_space<vmem>>, vector<8x256xf32>
    tpu.vector_store %arg6[%c24_42, %c0_43], %128 {strides = array<i32>} : memref<32x256xf32, #tpu.memory_space<vmem>>, vector<8x256xf32>,
    %c0_i32_44 = arith.constant 0 : i32
    %130 = arith.cmpi eq, %arg1, %c0_i32_44 : i32
    %131 = arith.extui %130 : i1 to i32
    %c0_i32_45 = arith.constant 0 : i32
    %132 = arith.cmpi ne, %131, %c0_i32_45 : i32
    scf.if %132 {
      %c0_46 = arith.constant 0 : index
      %c0_47 = arith.constant 0 : index
      %133 = vector.load %arg6[%c0_46, %c0_47] : memref<32x256xf32, #tpu.memory_space<vmem>>, vector<32x256xf32>
      %c0_48 = arith.constant 0 : index
      %c0_49 = arith.constant 0 : index
      %134 = vector.load %arg4[%c0_48, %c0_49] : memref<32x256xf32, #tpu.memory_space<vmem>>, vector<32x256xf32>
      %135 = arith.mulf %133, %134 : vector<32x256xf32>
      %136 = tpu.iota {dimensions = array<i32: 0>} : vector<32x256xi32>
      %c25_i32 = arith.constant 25 : i32
      %137 = vector.broadcast %c25_i32 : i32 to vector<32x256xi32>
      %138 = arith.cmpi slt, %136, %137 : vector<32x256xi32>
      %cst_50 = arith.constant -1.000000e+30 : f32
      %139 = vector.broadcast %cst_50 : f32 to vector<32x256xf32>
      %140 = arith.select %138, %135, %139 : vector<32x256xi1>, vector<32x256xf32>
      %cst_51 = arith.constant dense<0xFF800000> : vector<256xf32>
      %141 = vector.multi_reduction <maximumf>, %140, %cst_51 [0] : vector<32x256xf32> to vector<256xf32>
      %142 = vector.shape_cast %141 : vector<256xf32> to vector<1x256xf32>
      %143 = vector.broadcast %142 : vector<1x256xf32> to vector<32x256xf32>
      %144 = arith.subf %140, %143 : vector<32x256xf32>
      %145 = math.exp %144 : vector<32x256xf32>
      %cst_52 = arith.constant dense<0.000000e+00> : vector<256xf32>
      %146 = vector.multi_reduction <add>, %145, %cst_52 [0] : vector<32x256xf32> to vector<256xf32>
      %147 = vector.shape_cast %146 : vector<256xf32> to vector<1x256xf32>
      %148 = vector.broadcast %147 : vector<1x256xf32> to vector<32x256xf32>
      %149 = arith.divf %145, %148 : vector<32x256xf32>
      %c0_53 = arith.constant 0 : index
      %c0_54 = arith.constant 0 : index
      %c0_55 = arith.constant 0 : index
      %150 = vector.load %arg5[%c0_53, %c0_54, %c0_55] : memref<1x32x256xf32, #tpu.memory_space<vmem>>, vector<1x32x256xf32>
      %151 = vector.shape_cast %150 : vector<1x32x256xf32> to vector<32x256xf32>
      %152 = vector.shape_cast %149 : vector<32x256xf32> to vector<1x32x256xf32>
      tpu.vector_store %arg5[%c0_53, %c0_54, %c0_55], %152 {strides = array<i32>} : memref<1x32x256xf32, #tpu.memory_space<vmem>>, vector<1x32x256xf32>,
    } else {
    }
    return
  }
  func.func @transform_0(%arg0: i32, %arg1: i32) -> (i32, i32, i32) {
    %c0_i32 = arith.constant 0 : i32
    %c0_i32_0 = arith.constant 0 : i32
    return %arg0, %arg1, %c0_i32 : i32, i32, i32
  }
  func.func @transform_1(%arg0: i32, %arg1: i32) -> (i32, i32, i32) {
    %c0_i32 = arith.constant 0 : i32
    %c0_i32_0 = arith.constant 0 : i32
    return %arg0, %arg1, %c0_i32 : i32, i32, i32
  }
  func.func @transform_2(%arg0: i32, %arg1: i32) -> (i32, i32) {
    %c0_i32 = arith.constant 0 : i32
    %c0_i32_0 = arith.constant 0 : i32
    %c0_i32_1 = arith.constant 0 : i32
    return %c0_i32, %c0_i32_0 : i32, i32
  }
  func.func @transform_3(%arg0: i32, %arg1: i32) -> (i32, i32, i32) {
    %c0_i32 = arith.constant 0 : i32
    %c0_i32_0 = arith.constant 0 : i32
    %c0_i32_1 = arith.constant 0 : i32
    return %arg0, %c0_i32, %c0_i32_0 : i32, i32, i32
  }
}

</mosaic_0001>

<bundles_post_ra>
// kernel: tpu_custom_call.1
= control target key start
LH: loop header
LB: loop body
LE: loop exit
PB: predicated region body
PF: predicated region fallthrough
CT: control target
= control target key end

     0   :  { %s2382_s0 = inlined_call_operand.hbm [shape: f32[2,4,256], index: 0, kind: input, shape index: {}]   ;;  %s2383_s1 = inlined_call_operand.hbm [shape: f32[2,4,256], index: 1, kind: input, shape index: {}]   ;;  %s2384_s2 = inlined_call_operand.hbm [shape: f32[32,256], index: 2, kind: input, shape index: {}]   ;;  %s2385_s3 = inlined_call_operand.hbm [shape: f32[2,32,256], index: 3, kind: output, shape index: {}]  }
   0x1   :  { %2391 = sst [smem:[#allocation15_spill]] %s2384_s2 }
   0x2   :  { %8 = vsyncpa [#allocation4], 0 }
   0x3   :  { %10 = vsyncpa [#allocation4 + $0x1], 0 }
   0x4   :  { %11 = vsyncpa [#allocation7], 0 }
   0x5   :  { %13 = vsyncpa [#allocation7 + $0x1], 0 }
   0x6   :  { %14 = vsyncpa [#allocation5], 0 }
   0x7   :  { %16 = vsyncpa [#allocation5 + $0x1], 0  ;;  %s1716_s12 = smov 0   ;;  %s1718_s13 = smov 0  }
   0x8   :  { %s1720_s14 = smov 0   ;;  %s1722_s15 = smov 0  }
   0x9   :  { %s1724_s16 = smov 0   ;;  %s1726_s17 = smov 0  }
   0xa LB: > { %s1747_s18 = sadd.s32 4294967295, %s1663_s17   ;;  %s1335_s19 = sadd.s32 4294967294, %s1663_s17   ;;  %s1663_s17 = sphi %s1726_s17, %s22_s17   ;;  %s1659_s16 = sphi %s1724_s16, %s2414_s16   ;;  %s1655_s15 = sphi %s1722_s15, %s2413_s15   ;;  %s1651_s14 = sphi %s1720_s14, %s2412_s14   ;;  %s1647_s13 = sphi %s1718_s13, %s2411_s13   ;;  %s1643_s12 = sphi %s1716_s12, %s2410_s12  }
   0xb   : > { %p56_p0 = scmp.ne.s32.totalorder %s1647_s13, %s1643_s12  ;;  %p2386_p1 = scmp.eq.s32.totalorder %s1747_s18, 0 }
   0xc   : > { %p135_p3 = scmp.eq.s32.totalorder %s1335_s19, 1  ;;  %p1336_p5 = scmp.ge.s32.totalorder %s1663_s17, 1 }
   0xd   : > { %p1756_p4 = por %p2386_p1, %p56_p0  ;;  %p142_p7 = scmp.lt.s32.totalorder %s1663_s17, 3 }
   0xe   : > { %p1761_p6 = por %p135_p3, %p56_p0  ;;  %s1665_s23 = smov [#allocation8]  }
   0xf   : > { %s2392_s20 = scalar_select %p1756_p4, 1, 0 }
  0x10   : > { %s2393_s21 = scalar_select %p1761_p6, 1, 0 }
  0x11   : > { %p1766_p8 = pnand %p1336_p5, %p142_p7  ;;  %s154_s24 = sshll.u32 %s1665_s23, 4  ;;  %s155_s24 = int_to_ptr.vmem [resolvable:$true] %s154_s24 }
  0x12   : > { %s34_s26 = sadd.s32 1, %s1659_s16  ;;  %s2396_s2 = sld [smem:[#allocation15_spill]] }
  0x13   : > { %s2394_s22 = scalar_select %p1766_p8, 1, 0 }
  0x14   : > { %p1368_p9 = pneg %p1766_p8 }
  0x16   : > { %p1775_p11 = pnand %p1368_p9, %p2386_p1 }
  0x18   : > { %s1485_s29 = scalar_lea.hbm %s2396_s2, 1024  ;;  %p1487_p13 = pneg %p1775_p11 }
  0x19   : > { %p1486_p12 = scmp.ne.s32.totalorder %s2396_s2, %s1485_s29  ;;  %p1492_p5 = scmp.lt.u32.totalorder %s1485_s29, %s2396_s2 }
  0x1b   : > { %p1488_p0 = pnand %p1487_p13, %p1486_p12 }
  0x1d   : > { %p1489_p3 = pneg %p1488_p0 }
  0x1f   : > { %p1494_p7 = pnand %p1492_p5, %p1489_p3 }
  0x21   : > { %1497 = shalt.err (!%p1494_p7)
}
  0x22   : > { %s1498_s7 = scalar_lea.vmem %s155_s24, 1024  ;;  %p1506_p2 = scmp.lt.s32.totalorder %s155_s24, %s155_s24 }
  0x23   : > { %p1499_p9 = scmp.ne.s32.totalorder %s155_s24, %s1498_s7  ;;  %p1507_p6 = scmp.lt.s32.totalorder %s1498_s7, %s1498_s7 }
  0x25   : > { %p1501_p10 = pnand %p1499_p9, %p1487_p13  ;;  %p1508_p4 = por %p1507_p6, %p1506_p2 }
  0x27   : > { %p1502_p1 = pneg %p1501_p10 }
  0x29   : > { %p1509_p8 = pnand %p1508_p4, %p1502_p1 }
  0x2b   : > { %1512 = shalt.err (!%p1509_p8)
}
  0x2c   : > { %s1666_s8 = smov 256   ;;  %s1667_s9 = smov 16  }
  0x2d   : > { %1371 = dma.hbm_to_vmem [thread:$0]  (!%p1775_p11), %s2396_s2, 1024, %s155_s24, [#allocation7], %s1666_s8, %s1666_s8, %s1667_s9  }
  0x2e   : > { %p36_p1 = scmp.ge.s32.totalorder %s34_s26, 2  ;;  %s43_s19 = sadd.s32 1, %s1651_s14 }
  0x2f   : > { %p50_p2 = scmp.ne.s32.totalorder %s1651_s14, %s1647_s13  ;;  %p51_p4 = scmp.eq.s32.totalorder %s1663_s17, 0 }
  0x30   : > { %s2416_s26 = smov (%p36_p1, %s34_s26), 0  ;;  %p2399_p8 = scmp.eq.s32.totalorder %s1747_s18, 1 }
  0x31   : > { %2397 = sst [smem:[#allocation14_spill]] %s2416_s26  ;;  %p1802_p6 = por %p51_p4, %p50_p2 }
  0x32   : > { %p1808_p10 = por %p2399_p8, %p50_p2  ;;  %s38_s27 = ssub.s32 %s1659_s16, %s2416_s26 }
  0x33   : > { %p1384_p11 = scmp.lt.s32.totalorder %s1663_s17, 2  ;;  %p41_p12 = scmp.eq.s32.totalorder %s38_s27, 0 }
  0x34   : > { %s2400_s25 = scalar_select %p1808_p10, 1, 0 }
  0x35   : > { %s168_s24 = sand.u32 1, %s1651_s14   ;;  %s1355_s30 = sshll.u32 %s1659_s16, 7 }
  0x36   : > { %s1816_s28 = sshll.u32 %s168_s24, 3  ;;  %s1825_s6 = scalar_lea.hbm %s2382_s0, %s1355_s30 }
  0x37   : > { %s1819_s29 = scalar_select %p41_p12, %s1651_s14, %s43_s19  }
  0x38   : > { %s172_s7 = scalar_lea.vmem [#allocation3], %s1816_s28  ;;  %p1832_p13 = pnand %p1384_p11, %p1802_p6 }
  0x39   : > { %s182_s8 = sshll.u32 %s172_s7, 4  ;;  %s1839_s19 = scalar_lea.hbm %s2383_s1, %s1355_s30  ;;  %s1828_s8 = int_to_ptr.vmem [resolvable:$true] %s182_s8 }
  0x3a   : > { %s189_s27 = sand.u32 1, %s1663_s17   ;;  %s169_s4 = scalar_lea.sflag [#allocation4], %s168_s24 }
  0x3b   : > { %s1513_s5 = scalar_lea.hbm %s1825_s6, 128  ;;  %p1515_p3 = pneg %p1832_p13 }
  0x3c   : > { %p1514_p0 = scmp.ne.s32.totalorder %s1825_s6, %s1513_s5  ;;  %s1518_s2 = scalar_lea.hbm %s2382_s0, 256 }
  0x3d   : > { %p1519_p9 = scmp.lt.u32.totalorder %s1825_s6, %s2382_s0  ;;  %p1520_p1 = scmp.lt.u32.totalorder %s1518_s2, %s1513_s5 }
  0x3e   : > { %p1516_p5 = pnand %p1515_p3, %p1514_p0  ;;  %p1522_p4 = scmp.lt.u32.totalorder %s1513_s5, %s1825_s6 }
  0x3f   : > { %p1521_p2 = por %p1520_p1, %p1519_p9 }
  0x40   : > { %p1517_p7 = pneg %p1516_p5 }
  0x41   : > { %p1523_p6 = por %p1522_p4, %p1521_p2 }
  0x43   : > { %p1524_p8 = pnand %p1523_p6, %p1517_p7 }
  0x45   : > { %1527 = shalt.err (!%p1524_p8)
}
  0x46   : > { %s1528_s24 = scalar_lea.vmem %s1828_s8, 128  ;;  %s1668_s30 = smov [#allocation3]  }
  0x47   : > { %p1529_p11 = scmp.ne.s32.totalorder %s1828_s8, %s1528_s24  ;;  %s1533_s11 = sshll.u32 %s1668_s30, 4  ;;  %s1534_s11 = int_to_ptr.vmem [resolvable:$false] %s1533_s11 }
  0x48   : > { %s1535_s26 = scalar_lea.vmem %s1534_s11, 256  ;;  %p1536_p5 = scmp.lt.s32.totalorder %s1828_s8, %s1534_s11 }
  0x49   : > { %p1531_p12 = pnand %p1529_p11, %p1515_p3  ;;  %p1537_p9 = scmp.lt.s32.totalorder %s1535_s26, %s1528_s24 }
  0x4b   : > { %p1532_p0 = pneg %p1531_p12  ;;  %p1538_p1 = por %p1537_p9, %p1536_p5 }
  0x4d   : > { %p1539_p2 = pnand %p1538_p1, %p1532_p0 }
  0x4f   : > { %1542 = shalt.err (!%p1539_p2)
}
  0x50   : > { %1375 = dma.hbm_to_vmem [thread:$0]  (!%p1832_p13), %s1825_s6, 128, %s1828_s8, %s169_s4  }
  0x51   : > { %s193_s2 = scalar_lea.vmem [#allocation6], %s1816_s28  ;;  %s190_s23 = scalar_lea.sflag [#allocation7], %s189_s27 }
  0x52   : > { %s203_s5 = sshll.u32 %s193_s2, 4  ;;  %s1543_s7 = scalar_lea.hbm %s1839_s19, 128  ;;  %s204_s5 = int_to_ptr.vmem [resolvable:$true] %s203_s5 }
  0x53   : > { %p1544_p7 = scmp.ne.s32.totalorder %s1839_s19, %s1543_s7  ;;  %s1548_s30 = scalar_lea.hbm %s2383_s1, 256 }
  0x54   : > { %p1549_p8 = scmp.lt.u32.totalorder %s1839_s19, %s2383_s1  ;;  %p1550_p11 = scmp.lt.u32.totalorder %s1548_s30, %s1543_s7 }
  0x55   : > { %p1546_p4 = pnand %p1544_p7, %p1515_p3  ;;  %p1552_p0 = scmp.lt.u32.totalorder %s1543_s7, %s1839_s19 }
  0x56   : > { %p1551_p12 = por %p1550_p11, %p1549_p8 }
  0x57   : > { %p1547_p6 = pneg %p1546_p4 }
  0x58   : > { %p1553_p5 = por %p1552_p0, %p1551_p12 }
  0x5a   : > { %p1554_p9 = pnand %p1553_p5, %p1547_p6 }
  0x5c   : > { %1557 = shalt.err (!%p1554_p9)
}
  0x5d   : > { %s1558_s28 = scalar_lea.vmem %s204_s5, 128  ;;  %s1669_s6 = smov [#allocation6]  }
  0x5e   : > { %p1559_p1 = scmp.ne.s32.totalorder %s204_s5, %s1558_s28  ;;  %s1563_s8 = sshll.u32 %s1669_s6, 4  ;;  %s1564_s8 = int_to_ptr.vmem [resolvable:$false] %s1563_s8 }
  0x5f   : > { %s1565_s27 = scalar_lea.vmem %s1564_s8, 256  ;;  %p1566_p4 = scmp.lt.s32.totalorder %s204_s5, %s1564_s8 }
  0x60   : > { %p1561_p2 = pnand %p1559_p1, %p1515_p3  ;;  %p1567_p10 = scmp.lt.s32.totalorder %s1565_s27, %s1558_s28 }
  0x62   : > { %p1562_p7 = pneg %p1561_p2  ;;  %p1568_p8 = por %p1567_p10, %p1566_p4 }
  0x64   : > { %p1569_p11 = pnand %p1568_p8, %p1562_p7 }
  0x66   : > { %1572 = shalt.err (!%p1569_p11)
}
  0x67   : > { %1378 = dma.hbm_to_vmem [thread:$0]  (!%p1832_p13), %s1839_s19, 128, %s204_s5, %s190_s23  }
  0x68   : > { %p2402_p6 = scmp.ne.s32.totalorder %s2394_s22, 0 }
  0x69   : > { %s1892_s4 = sand.u32 (!%p2402_p6), 1, %s1647_s13   ;;  %p2403_p10 = scmp.ne.s32.totalorder (!%p2402_p6), %s2392_s20, 0 }
  0x6a   : > { %212 = sbr.rel (%p2402_p6) target bundleno = 463 (0x1cf), region = 32  ;;  %s1346_s2 = sshll.u32 (!%p2402_p6), %s1892_s4, 3 }
  0x6b   : > { %s215_s7 = scalar_lea.sflag (!%p2402_p6), [#allocation4], %s1892_s4  ;;  %s1896_s10 = scalar_lea.vmem (!%p2402_p6), [#allocation3], %s1346_s2 }
  0x71   : > { %1626 = dma.done.wait (%p2403_p10), %s215_s7, 128  }
  0x72   : > { %1628 = vsyncadd (%p2403_p10), %s215_s7, 4294967168  ;;  %s223_s9 = sand.u32 1, %s1747_s18   ;;  %s227_s19 = scalar_lea.vmem [#allocation6], %s1346_s2 }
  0x73   : > { %s224_s22 = scalar_lea.sflag [#allocation7], %s223_s9 }
  0x74   : > { %1630 = dma.done.wait (%p2403_p10), %s224_s22, 128  }
  0x75   : > { %1632 = vsyncadd (%p2403_p10), %s224_s22, 4294967168  ;;  %p2404_p13 = scmp.eq.s32.totalorder %s1747_s18, 0 }
  0x77   : > { %1634 = dma.done.wait (%p2404_p13), [#allocation7], 1024   ;;  %p2405_p3 = pmov %p2404_p13 }
  0x78   : > { %v1911_v0 = vld [vmem:[%s227_s19] sm:$0xff]  ;;  %s1670_s5 = smov 1   ;;  %s1671_s23 = smov 127   ;;  %v1968_v2 = vld [vmem:[%s1896_s10] sm:$0xff]  ;;  %v299_v3 = vlaneseq  ;;  %vm277_vm0 = vcmask 1043456   ;;  %vm502_vm7 = vcmask 1040384  }
  0x79   : > { %1636 = vsyncadd (%p2405_p3), [#allocation7], 4294966272  ;;  %295 = vrot.lane.b32.xlu1 %v1911_v0, %s1670_s5  ;;  %1030 = vrot.lane.b32.xlu0 %v1911_v0, %s1671_s23  ;;  %v1917_v1 = vcombine.high %v1911_v0, %v1911_v0  ;;  %s1672_s20 = smov 30   ;;  %s1673_s18 = smov 31   ;;  %v273_v4 = vmul.f32 %v1911_v0, %v1968_v2  ;;  %vm505_vm11 = vcmask 1041408   ;;  %vm508_vm12 = vcmask 1042432  }
  0x7a   : > { %s1674_s24 = smov 97   ;;  %s1675_s30 = smov 98   ;;  %v1973_v5 = vand.u32 127, %v299_v3 }
  0x7b   : > { %s1676_s11 = smov 2   ;;  %s1677_s26 = smov 32   ;;  %v275_v6 = vcombine.high %v273_v4, %v273_v4  ;;  %v278_v9 = vsel %vm277_vm0, %v273_v4, 0.0 }
  0x7c   : > { %s1678_s28 = smov 110   ;;  %s1679_s6 = smov 14   ;;  %vm301_vm1 = vcmp.lt.s32.totalorder %v1973_v5, 1  ;;  %v279_v13 = vrot.slane %v278_v9, 4  ;;  %vm530_vm2 = vcmp.lt.s32.totalorder %v1973_v5, 30  ;;  %vm1034_vm3 = vcmp.lt.s32.totalorder %v1973_v5, 127 }
  0x7d   : > { %526 = vrot.lane.b32.xlu0 %v1911_v0, %s1672_s20  ;;  %297 = vrot.lane.b32.xlu1 %v1917_v1, %s1670_s5  ;;  %s1680_s8 = smov 33   ;;  %s1681_s27 = smov 111   ;;  %v285_v10 = vsel %vm277_vm0, %v275_v6, 0.0  ;;  %vm559_vm4 = vcmp.lt.s32.totalorder %v1973_v5, 31  ;;  %vm782_vm5 = vcmp.lt.s32.totalorder %v1973_v5, 97  ;;  %vm811_vm6 = vcmp.lt.s32.totalorder %v1973_v5, 98 }
  0x7e   : > { %s1682_s2 = smov 15   ;;  %s1683_s7 = smov 34   ;;  %v286_v16 = vrot.slane %v285_v10, 4  ;;  %v280_v18 = vadd.f32 %v279_v13, %v278_v9  ;;  %vm330_vm8 = vcmp.lt.s32.totalorder %v1973_v5, 2  ;;  %vm588_vm9 = vcmp.lt.s32.totalorder %v1973_v5, 32 }
  0x7f   : > { %s1684_s9 = smov 112   ;;  %s1685_s22 = smov 16   ;;  %vm840_vm10 = vcmp.lt.s32.totalorder %v1973_v5, 110  ;;  %vm359_vm13 = vcmp.lt.s32.totalorder %v1973_v5, 14  ;;  %vm617_vm14 = vcmp.lt.s32.totalorder %v1973_v5, 33  ;;  %vm869_vm15 = vcmp.lt.s32.totalorder %v1973_v5, 111 }
  0x80   : > { %s1686_s19 = smov 94   ;;  %s1687_s5 = smov 113   ;;  %v287_v25 = vadd.f32 %v286_v16, %v285_v10  ;;  %v281_v32 = vrot.slane %v280_v18, 2 }
  0x81   : > { %528 = vrot.lane.b32.xlu1 %v1917_v1, %s1672_s20  ;;  %1032 = vrot.lane.b32.xlu0 %v1917_v1, %s1671_s23  ;;  %s1688_s23 = smov 17   ;;  %s1689_s20 = smov 95  }
  0x82   : > { %v288_v35 = vrot.slane %v287_v25, 2  ;;  %v282_v44 = vadd.f32 %v281_v32, %v280_v18  ;;  %p2406_p0 = scmp.ne.s32.totalorder %s2400_s25, 0 }
  0x84   : > { %v289_v48 = vadd.f32 %v288_v35, %v287_v25  ;;  %v283_v59 = vrot.slane %v282_v44, 1 }
  0x85   : > { %557 = vrot.lane.b32.xlu1 %v1917_v1, %s1673_s18  ;;  %555 = vrot.lane.b32.xlu0 %v1911_v0, %s1673_s18  ;;  %s1690_s18 = smov 114  }
  0x86   : > { %v290_v61 = vrot.slane %v289_v48, 1 }
  0x89   : > { %780 = vrot.lane.b32.xlu1 %v1917_v1, %s1674_s24  ;;  %778 = vrot.lane.b32.xlu0 %v1911_v0, %s1674_s24  ;;  %s1691_s24 = smov 18  }
  0x8d   : > { %809 = vrot.lane.b32.xlu1 %v1917_v1, %s1675_s30  ;;  %807 = vrot.lane.b32.xlu0 %v1911_v0, %s1675_s30  ;;  %s1692_s30 = smov 96  }
  0x91   : > { %328 = vrot.lane.b32.xlu1 %v1917_v1, %s1676_s11  ;;  %326 = vrot.lane.b32.xlu0 %v1911_v0, %s1676_s11  ;;  %s1693_s11 = smov 126  }
  0x95   : > { %586 = vrot.lane.b32.xlu1 %v1917_v1, %s1677_s26  ;;  %584 = vrot.lane.b32.xlu0 %v1911_v0, %s1677_s26  ;;  %s1357_s26 = sshll.u32 %s1655_s15, 10  ;;  %s1202_s15 = scalar_lea.sflag [#allocation5], %s1892_s4 }
  0x99   : > { %838 = vrot.lane.b32.xlu1 %v1917_v1, %s1678_s28  ;;  %836 = vrot.lane.b32.xlu0 %v1911_v0, %s1678_s28 }
  0x9d   : > { %357 = vrot.lane.b32.xlu1 %v1917_v1, %s1679_s6  ;;  %355 = vrot.lane.b32.xlu0 %v1911_v0, %s1679_s6 }
  0xa1   : > { %615 = vrot.lane.b32.xlu1 %v1917_v1, %s1680_s8  ;;  %613 = vrot.lane.b32.xlu0 %v1911_v0, %s1680_s8 }
  0xa5   : > { %867 = vrot.lane.b32.xlu1 %v1917_v1, %s1681_s27  ;;  %865 = vrot.lane.b32.xlu0 %v1911_v0, %s1681_s27 }
  0xa9   : > { %386 = vrot.lane.b32.xlu1 %v1917_v1, %s1682_s2  ;;  %384 = vrot.lane.b32.xlu0 %v1911_v0, %s1682_s2  ;;  %s2330_s2 = scalar_lea.hbm %s2385_s3, %s1357_s26 }
  0xad   : > { %644 = vrot.lane.b32.xlu1 %v1917_v1, %s1683_s7  ;;  %642 = vrot.lane.b32.xlu0 %v1911_v0, %s1683_s7 }
  0xb1   : > { %896 = vrot.lane.b32.xlu1 %v1917_v1, %s1684_s9  ;;  %894 = vrot.lane.b32.xlu0 %v1911_v0, %s1684_s9  ;;  %s1694_s9 = smov [#allocation9]  }
  0xb5   : > { %415 = vrot.lane.b32.xlu1 %v1917_v1, %s1685_s22  ;;  %413 = vrot.lane.b32.xlu0 %v1911_v0, %s1685_s22 }
  0xb9   : > { %673 = vrot.lane.b32.xlu1 %v1917_v1, %s1686_s19  ;;  %671 = vrot.lane.b32.xlu0 %v1911_v0, %s1686_s19  ;;  %s1577_s19 = sshll.u32 %s1694_s9, 4  ;;  %s1578_s19 = int_to_ptr.vmem [resolvable:$false] %s1577_s19 }
  0xbd   : > { %925 = vrot.lane.b32.xlu1 %v1917_v1, %s1687_s5  ;;  %923 = vrot.lane.b32.xlu0 %v1911_v0, %s1687_s5  ;;  %s1579_s5 = scalar_lea.vmem %s1578_s19, 2048 }
  0xc1   : > { %444 = vrot.lane.b32.xlu1 %v1917_v1, %s1688_s23  ;;  %442 = vrot.lane.b32.xlu0 %v1911_v0, %s1688_s23 }
  0xc5   : > { %702 = vrot.lane.b32.xlu1 %v1917_v1, %s1689_s20  ;;  %700 = vrot.lane.b32.xlu0 %v1911_v0, %s1689_s20 }
  0xc9   : > { %954 = vrot.lane.b32.xlu1 %v1917_v1, %s1690_s18  ;;  %952 = vrot.lane.b32.xlu0 %v1911_v0, %s1690_s18 }
  0xcd   : > { %473 = vrot.lane.b32.xlu1 %v1917_v1, %s1691_s24  ;;  %471 = vrot.lane.b32.xlu0 %v1911_v0, %s1691_s24 }
  0xd1   : > { %731 = vrot.lane.b32.xlu1 %v1917_v1, %s1692_s30  ;;  %729 = vrot.lane.b32.xlu0 %v1911_v0, %s1692_s30 }
  0xd5   : > { %983 = vrot.lane.b32.xlu1 %v1917_v1, %s1693_s11  ;;  %981 = vrot.lane.b32.xlu0 %v1911_v0, %s1693_s11 }
  0xeb   : > { %v296_v7 = vpop.permute.xlu1 %295  ;;  %v1031_v8 = vpop.permute.xlu0 %1030 }
  0xef   : > { %v527_v11 = vpop.permute.xlu0 %526  ;;  %v298_v12 = vpop.permute.xlu1 %297 }
  0xf0   : > { %v302_v14 = vsel %vm301_vm1, %v296_v7, %v298_v12  ;;  %v303_v15 = vsel %vm301_vm1, %v298_v12, %v296_v7  ;;  %vm513_vm1 = vcmask 1044480  }
  0xf1   : > { %v306_v17 = vcombine.low %v303_v15, %v302_v14  ;;  %v1999_v14 = vadd.f32 %v290_v61, %v289_v48 }
  0xf3   : > { %v529_v19 = vpop.permute.xlu1 %528  ;;  %v1033_v20 = vpop.permute.xlu0 %1032  ;;  %v308_v1 = vmul.f32 %v306_v17, %v1968_v2 }
  0xf4   : > { %v531_v21 = vsel %vm530_vm2, %v527_v11, %v529_v19  ;;  %v532_v22 = vsel %vm530_vm2, %v529_v19, %v527_v11  ;;  %v1035_v23 = vsel %vm1034_vm3, %v1031_v8, %v1033_v20  ;;  %v1036_v24 = vsel %vm1034_vm3, %v1033_v20, %v1031_v8 }
  0xf5   : > { %v535_v26 = vcombine.low %v532_v22, %v531_v21  ;;  %v1039_v27 = vcombine.low %v1035_v23, %v1036_v24  ;;  %v1995_v11 = vadd.f32 %v283_v59, %v282_v44  ;;  %v312_v18 = vsel %vm277_vm0, %v308_v1, 0.0 }
  0xf6   : > { %v313_v35 = vrot.slane %v312_v18, 4  ;;  %vm516_vm2 = vcmask 1045504   ;;  %vm388_vm3 = vcmp.lt.s32.totalorder %v1973_v5, 15 }
  0xf7   : > { %v537_v28 = vmul.f32 %v535_v26, %v1968_v2  ;;  %v1041_v29 = vmul.f32 %v1039_v27, %v1968_v2  ;;  %v558_v30 = vpop.permute.xlu1 %557  ;;  %v556_v31 = vpop.permute.xlu0 %555 }
  0xf8   : > { %v560_v33 = vsel %vm559_vm4, %v556_v31, %v558_v30  ;;  %v561_v34 = vsel %vm559_vm4, %v558_v30, %v556_v31  ;;  %vm519_vm4 = vcmask 1046528  }
  0xf9   : > { %v539_v36 = vcombine.high %v537_v28, %v537_v28  ;;  %v541_v37 = vsel %vm277_vm0, %v537_v28, 0.0  ;;  %v1043_v38 = vcombine.high %v1041_v29, %v1041_v29  ;;  %v564_v41 = vcombine.low %v561_v34, %v560_v33 }
  0xfa   : > { %v542_v39 = vrot.slane %v541_v37, 4  ;;  %v1045_v47 = vsel %vm277_vm0, %v1041_v29, 0.0  ;;  %v310_v34 = vcombine.high %v308_v1, %v308_v1 }
  0xfb   : > { %v548_v40 = vsel %vm277_vm0, %v539_v36, 0.0  ;;  %v781_v42 = vpop.permute.xlu1 %780  ;;  %v779_v43 = vpop.permute.xlu0 %778  ;;  %v1052_v49 = vsel %vm277_vm0, %v1043_v38, 0.0  ;;  %v566_v50 = vmul.f32 %v564_v41, %v1968_v2  ;;  %v1046_v54 = vrot.slane %v1045_v47, 4 }
  0xfc   : > { %v543_v45 = vadd.f32 %v542_v39, %v541_v37  ;;  %v549_v46 = vrot.slane %v548_v40, 4  ;;  %v783_v51 = vsel %vm782_vm5, %v779_v43, %v781_v42  ;;  %v1053_v60 = vrot.slane %v1052_v49, 4 }
  0xfd   : > { %v568_v55 = vcombine.high %v566_v50, %v566_v50  ;;  %v570_v56 = vsel %vm277_vm0, %v566_v50, 0.0  ;;  %v1047_v6 = vadd.f32 %v1046_v54, %v1045_v47  ;;  %v784_v13 = vsel %vm782_vm5, %v781_v42, %v779_v43 }
  0xfe   : > { %v550_v52 = vadd.f32 %v549_v46, %v548_v40  ;;  %v544_v53 = vrot.slane %v543_v45, 2  ;;  %v571_v63 = vrot.slane %v570_v56, 4  ;;  %v1054_v12 = vadd.f32 %v1053_v60, %v1052_v49 }
  0xff   : > { %v810_v57 = vpop.permute.xlu1 %809  ;;  %v808_v58 = vpop.permute.xlu0 %807  ;;  %v577_v0 = vsel %vm277_vm0, %v568_v55, 0.0  ;;  %v787_v19 = vcombine.low %v783_v51, %v784_v13  ;;  %v1048_v23 = vrot.slane %v1047_v6, 2  ;;  %v2017_v51 = vadd.f32 %v313_v35, %v312_v18 }
 0x100   : > { %v551_v62 = vrot.slane %v550_v52, 2  ;;  %v545_v4 = vadd.f32 %v544_v53, %v543_v45  ;;  %v572_v7 = vadd.f32 %v571_v63, %v570_v56  ;;  %v578_v8 = vrot.slane %v577_v0, 4 }
 0x101   : > { %v812_v20 = vsel %vm811_vm6, %v808_v58, %v810_v57  ;;  %v813_v21 = vsel %vm811_vm6, %v810_v57, %v808_v58  ;;  %v1055_v28 = vrot.slane %v1054_v12, 2  ;;  %v789_v29 = vmul.f32 %v787_v19, %v1968_v2 }
 0x102   : > { %v552_v15 = vadd.f32 %v551_v62, %v550_v52  ;;  %v573_v16 = vrot.slane %v572_v7, 2  ;;  %v579_v17 = vadd.f32 %v578_v8, %v577_v0  ;;  %v546_v22 = vrot.slane %v545_v4, 1 }
 0x103   : > { %v329_v9 = vpop.permute.xlu1 %328  ;;  %v327_v10 = vpop.permute.xlu0 %326  ;;  %v816_v30 = vcombine.low %v812_v20, %v813_v21  ;;  %v791_v36 = vcombine.high %v789_v29, %v789_v29  ;;  %v793_v37 = vsel %vm277_vm0, %v789_v29, 0.0  ;;  %v1049_v39 = vadd.f32 %v1048_v23, %v1047_v6 }
 0x104   : > { %v574_v24 = vadd.f32 %v573_v16, %v572_v7  ;;  %v580_v25 = vrot.slane %v579_v17, 2  ;;  %v553_v31 = vrot.slane %v552_v15, 1  ;;  %v547_v38 = vadd.f32 %v546_v22, %v545_v4 }
 0x105   : > { %v1056_v44 = vadd.f32 %v1055_v28, %v1054_v12  ;;  %v794_v45 = vrot.slane %v793_v37, 4  ;;  %v800_v46 = vsel %vm277_vm0, %v791_v36, 0.0  ;;  %v331_v50 = vsel %vm330_vm8, %v327_v10, %v329_v9 }
 0x106   : > { %v575_v32 = vrot.slane %v574_v24, 1  ;;  %v581_v33 = vadd.f32 %v580_v25, %v579_v17  ;;  %v554_v47 = vadd.f32 %v553_v31, %v552_v15  ;;  %v319_v52 = vsel %vm277_vm0, %v310_v34, 0.0 }
 0x107   : > { %v587_v26 = vpop.permute.xlu1 %586  ;;  %v585_v27 = vpop.permute.xlu0 %584  ;;  %v795_v53 = vadd.f32 %v794_v45, %v793_v37  ;;  %v801_v54 = vrot.slane %v800_v46, 4  ;;  %v1050_v55 = vrot.slane %v1049_v39, 1  ;;  %v818_v57 = vmul.f32 %v816_v30, %v1968_v2 }
 0x108   : > { %v576_v40 = vadd.f32 %v575_v32, %v574_v24  ;;  %v582_v41 = vrot.slane %v581_v33, 1  ;;  %v332_v58 = vsel %vm330_vm8, %v329_v9, %v327_v10  ;;  %v1057_v61 = vrot.slane %v1056_v44, 1 }
 0x109   : > { %v796_v62 = vrot.slane %v795_v53, 2  ;;  %v802_v63 = vadd.f32 %v801_v54, %v800_v46  ;;  %v335_v0 = vcombine.low %v332_v58, %v331_v50  ;;  %v820_v1 = vcombine.high %v818_v57, %v818_v57 }
 0x10a   : > { %v583_v48 = vadd.f32 %v582_v41, %v581_v33  ;;  %v2013_v49 = vsel %vm502_vm7, %v547_v38, %v576_v40  ;;  %v822_v4 = vsel %vm277_vm0, %v818_v57, 0.0  ;;  %v589_v6 = vsel %vm588_vm9, %v585_v27, %v587_v26 }
 0x10b   : > { %v839_v42 = vpop.permute.xlu1 %838  ;;  %v837_v43 = vpop.permute.xlu0 %836  ;;  %v590_v7 = vsel %vm588_vm9, %v587_v26, %v585_v27  ;;  %v797_v8 = vadd.f32 %v796_v62, %v795_v53  ;;  %v803_v9 = vrot.slane %v802_v63, 2  ;;  %v823_v10 = vrot.slane %v822_v4, 4 }
 0x10c   : > { %v2021_v56 = vsel %vm502_vm7, %v554_v47, %v583_v48  ;;  %v337_v12 = vmul.f32 %v335_v0, %v1968_v2  ;;  %v829_v13 = vsel %vm277_vm0, %v820_v1, 0.0  ;;  %v593_v15 = vcombine.low %v590_v7, %v589_v6 }
 0x10d   : > { %v841_v16 = vsel %vm840_vm10, %v837_v43, %v839_v42  ;;  %v842_v17 = vsel %vm840_vm10, %v839_v42, %v837_v43  ;;  %v1051_v20 = vadd.f32 %v1050_v55, %v1049_v39  ;;  %v1058_v21 = vadd.f32 %v1057_v61, %v1056_v44 }
 0x10e   : > { %v824_v22 = vadd.f32 %v823_v10, %v822_v4  ;;  %v830_v23 = vrot.slane %v829_v13, 4  ;;  %v804_v24 = vadd.f32 %v803_v9, %v802_v63  ;;  %v339_v25 = vcombine.high %v337_v12, %v337_v12 }
 0x10f   : > { %v2026_v59 = vpop.permute.xlu1 %357  ;;  %v2028_v60 = vpop.permute.xlu0 %355  ;;  %v595_v26 = vmul.f32 %v593_v15, %v1968_v2  ;;  %v845_v27 = vcombine.low %v841_v16, %v842_v17  ;;  %v1107_v30 = vshrl.u32 %v299_v3, 7  ;;  %v315_v31 = vrot.slane %v2017_v51, 2 }
 0x110   : > { %v825_v28 = vrot.slane %v824_v22, 2  ;;  %v831_v29 = vadd.f32 %v830_v23, %v829_v13  ;;  %v320_v32 = vrot.slane %v319_v52, 4  ;;  %v798_v33 = vrot.slane %v797_v8, 1 }
 0x111   : > { %v597_v34 = vcombine.high %v595_v26, %v595_v26  ;;  %v1061_v35 = vsel %vm502_vm7, %v1051_v20, 0.0  ;;  %v1062_v36 = vsel %vm502_vm7, %v1058_v21, 0.0  ;;  %v805_v39 = vrot.slane %v804_v24, 1 }
 0x112   : > { %v826_v37 = vadd.f32 %v825_v28, %v824_v22  ;;  %v832_v38 = vrot.slane %v831_v29, 2  ;;  %v341_v40 = vsel %vm277_vm0, %v337_v12, 0.0  ;;  %v348_v41 = vsel %vm277_vm0, %v339_v25, 0.0 }
 0x113   : > { %v2041_v18 = vpop.permute.xlu1 %615  ;;  %v2043_v19 = vpop.permute.xlu0 %613  ;;  %v847_v3 = vmul.f32 %v845_v27, %v1968_v2  ;;  %v599_v46 = vsel %vm277_vm0, %v595_v26, 0.0  ;;  %v606_v47 = vsel %vm277_vm0, %v597_v34, 0.0  ;;  %v321_v48 = vadd.f32 %v320_v32, %v319_v52 }
 0x114   : > { %v827_v44 = vrot.slane %v826_v37, 1  ;;  %v833_v45 = vadd.f32 %v832_v38, %v831_v29  ;;  %v1063_v50 = vsel %vm505_vm11, %v1061_v35, 0.0  ;;  %v799_v53 = vadd.f32 %v798_v33, %v797_v8 }
 0x115   : > { %v849_v54 = vcombine.high %v847_v3, %v847_v3  ;;  %v342_v58 = vrot.slane %v341_v40, 4  ;;  %v349_v61 = vrot.slane %v348_v41, 4  ;;  %v1064_v62 = vsel %vm505_vm11, %v1062_v36, 0.0 }
 0x116   : > { %v828_v55 = vadd.f32 %v827_v44, %v826_v37  ;;  %v834_v57 = vrot.slane %v833_v45, 1  ;;  %v600_v63 = vrot.slane %v599_v46, 4  ;;  %v607_v0 = vrot.slane %v606_v47, 4 }
 0x117   : > { %v868_v42 = vpop.permute.xlu1 %867  ;;  %v866_v43 = vpop.permute.xlu0 %865  ;;  %v2060_v1 = vadd.s32 24, %v1107_v30  ;;  %v806_v4 = vadd.f32 %v805_v39, %v804_v24  ;;  %v851_v7 = vsel %vm277_vm0, %v847_v3, 0.0  ;;  %v316_v8 = vadd.f32 %v315_v31, %v2017_v51 }
 0x118   : > { %v835_v6 = vadd.f32 %v834_v57, %v833_v45  ;;  %v2063_v52 = vsel %vm502_vm7, %v799_v53, %v828_v55  ;;  %v322_v9 = vrot.slane %v321_v48, 2  ;;  %v1065_v10 = vsel %vm508_vm12, %v1063_v50, 0.0 }
 0x119   : > { %v858_v12 = vsel %vm277_vm0, %v849_v54, 0.0  ;;  %v1066_v16 = vsel %vm508_vm12, %v1064_v62, 0.0  ;;  %v343_v20 = vadd.f32 %v342_v58, %v341_v40  ;;  %v350_v21 = vadd.f32 %v349_v61, %v348_v41 }
 0x11a   : > { %v2071_v17 = vsel %vm502_vm7, %v806_v4, %v835_v6  ;;  %v601_v22 = vadd.f32 %v600_v63, %v599_v46  ;;  %v608_v23 = vadd.f32 %v607_v0, %v606_v47  ;;  %v852_v24 = vrot.slane %v851_v7, 4 }
 0x11b   : > { %v387_v13 = vpop.permute.xlu1 %386  ;;  %v385_v15 = vpop.permute.xlu0 %384  ;;  %v360_v51 = vsel %vm359_vm13, %v2028_v60, %v2026_v59  ;;  %v859_v25 = vrot.slane %v858_v12, 4  ;;  %v361_v26 = vsel %vm359_vm13, %v2026_v59, %v2028_v60  ;;  %v618_v27 = vsel %vm617_vm14, %v2043_v19, %v2041_v18 }
 0x11c   : > { %v317_v28 = vrot.slane %v316_v8, 1  ;;  %v323_v29 = vadd.f32 %v322_v9, %v321_v48  ;;  %v1067_v30 = vsel %vm277_vm0, %v1065_v10, 0.0  ;;  %v1068_v31 = vsel %vm277_vm0, %v1066_v16, 0.0 }
 0x11d   : > { %v344_v32 = vrot.slane %v343_v20, 2  ;;  %v351_v33 = vrot.slane %v350_v21, 2  ;;  %v364_v34 = vcombine.low %v361_v26, %v360_v51  ;;  %v619_v59 = vsel %vm617_vm14, %v2041_v18, %v2043_v19 }
 0x11e   : > { %v602_v60 = vrot.slane %v601_v22, 2  ;;  %v609_v35 = vrot.slane %v608_v23, 2  ;;  %v853_v36 = vadd.f32 %v852_v24, %v851_v7  ;;  %v622_v37 = vcombine.low %v619_v59, %v618_v27 }
 0x11f   : > { %v2092_v38 = vpop.permute.xlu1 %644  ;;  %v2094_v39 = vpop.permute.xlu0 %642  ;;  %v860_v40 = vadd.f32 %v859_v25, %v858_v12  ;;  %v366_v41 = vmul.f32 %v364_v34, %v1968_v2  ;;  %v870_v3 = vsel %vm869_vm15, %v866_v43, %v868_v42  ;;  %v871_v44 = vsel %vm869_vm15, %v868_v42, %v866_v43 }
 0x120   : > { %v318_v45 = vadd.f32 %v317_v28, %v316_v8  ;;  %v324_v18 = vrot.slane %v323_v29, 1  ;;  %v624_v19 = vmul.f32 %v622_v37, %v1968_v2  ;;  %v874_v46 = vcombine.low %v870_v3, %v871_v44 }
 0x121   : > { %v345_v47 = vadd.f32 %v344_v32, %v343_v20  ;;  %v368_v48 = vcombine.high %v366_v41, %v366_v41  ;;  %v389_v50 = vsel %vm388_vm3, %v385_v15, %v387_v13  ;;  %v390_v53 = vsel %vm388_vm3, %v387_v13, %v385_v15  ;;  %v1096_v32 = vld [vmem:[#allocation8 + $0x30] sm:$0xff] }
 0x122   : > { %v1069_v54 = vsel %vm513_vm1, %v1067_v30, 0.0  ;;  %v1070_v55 = vsel %vm513_vm1, %v1068_v31, 0.0  ;;  %v352_v57 = vadd.f32 %v351_v33, %v350_v21  ;;  %v603_v58 = vadd.f32 %v602_v60, %v601_v22  ;;  %v1097_v33 = vld [vmem:[#allocation8 + $0x38] sm:$0xff] }
 0x123   : > { %v610_v42 = vadd.f32 %v609_v35, %v608_v23  ;;  %v854_v43 = vrot.slane %v853_v36, 2  ;;  %v861_v61 = vrot.slane %v860_v40, 2  ;;  %v370_v62 = vsel %vm277_vm0, %v366_v41, 0.0  ;;  %v2111_v7 = vpop.permute.xlu1 %896  ;;  %v2113_v8 = vpop.permute.xlu0 %894 }
 0x124   : > { %v377_v63 = vsel %vm277_vm0, %v368_v48, 0.0  ;;  %v626_v0 = vcombine.high %v624_v19, %v624_v19  ;;  %v876_v4 = vmul.f32 %v874_v46, %v1968_v2  ;;  %v393_v6 = vcombine.low %v390_v53, %v389_v50 }
 0x125   : > { %v325_v9 = vadd.f32 %v324_v18, %v323_v29  ;;  %v503_v10 = vsel %vm502_vm7, %v1995_v11, %v318_v45  ;;  %v1071_v12 = vsel %vm516_vm2, %v1069_v54, 0.0  ;;  %v346_v13 = vrot.slane %v345_v47, 1 }
 0x126   : > { %v1072_v15 = vsel %vm516_vm2, %v1070_v55, 0.0  ;;  %v353_v16 = vrot.slane %v352_v57, 1  ;;  %v371_v20 = vrot.slane %v370_v62, 4  ;;  %v628_v21 = vsel %vm277_vm0, %v624_v19, 0.0 }
 0x127   : > { %vm646_vm5 = vcmp.lt.s32.totalorder %v1973_v5, 34  ;;  %v604_v22 = vrot.slane %v603_v58, 1  ;;  %v611_v23 = vrot.slane %v610_v42, 1  ;;  %v855_v24 = vadd.f32 %v854_v43, %v853_v36  ;;  %v416_v36 = vpop.permute.xlu1 %415  ;;  %v414_v37 = vpop.permute.xlu0 %413 }
 0x128   : > { %v378_v51 = vrot.slane %v377_v63, 4  ;;  %vm898_vm6 = vcmp.lt.s32.totalorder %v1973_v5, 112  ;;  %v862_v25 = vadd.f32 %v861_v61, %v860_v40  ;;  %v635_v11 = vsel %vm277_vm0, %v626_v0, 0.0 }
 0x129   : > { %v880_v26 = vsel %vm277_vm0, %v876_v4, 0.0  ;;  %v395_v27 = vmul.f32 %v393_v6, %v1968_v2  ;;  %v504_v28 = vsel %vm502_vm7, %v1999_v14, %v325_v9  ;;  %v1073_v29 = vsel %vm519_vm4, %v1071_v12, 0.0 }
 0x12a   : > { %v347_v30 = vadd.f32 %v346_v13, %v345_v47  ;;  %v629_v31 = vrot.slane %v628_v21, 4  ;;  %vm417_vm8 = vcmp.lt.s32.totalorder %v1973_v5, 16  ;;  %v1074_v34 = vsel %vm519_vm4, %v1072_v15, 0.0 }
 0x12b   : > { %v354_v59 = vadd.f32 %v353_v16, %v352_v57  ;;  %v372_v60 = vadd.f32 %v371_v20, %v370_v62  ;;  %v878_v35 = vcombine.high %v876_v4, %v876_v4  ;;  %v605_v40 = vadd.f32 %v604_v22, %v603_v58  ;;  %v674_v6 = vpop.permute.xlu1 %673  ;;  %v672_v9 = vpop.permute.xlu0 %671 }
 0x12c   : > { %v379_v41 = vadd.f32 %v378_v51, %v377_v63  ;;  %v636_v3 = vrot.slane %v635_v11, 4  ;;  %v881_v44 = vrot.slane %v880_v26, 4  ;;  %vm675_vm7 = vcmp.lt.s32.totalorder %v1973_v5, 94 }
 0x12d   : > { %v612_v14 = vadd.f32 %v611_v23, %v610_v42  ;;  %v856_v45 = vrot.slane %v855_v24, 1  ;;  %v863_v18 = vrot.slane %v862_v25, 1  ;;  %v397_v19 = vcombine.high %v395_v27, %v395_v27 }
 0x12e   : > { %v2131_v46 = vmul.f32 %v1096_v32, %v1073_v29  ;;  %v2133_v47 = vmul.f32 %v1097_v33, %v1074_v34  ;;  %v2136_v48 = vsel %vm505_vm11, %v503_v10, %v347_v30  ;;  %v630_v50 = vadd.f32 %v629_v31, %v628_v21 }
 0x12f   : > { %v2139_v53 = vsel %vm505_vm11, %v504_v28, %v354_v59  ;;  %v373_v54 = vrot.slane %v372_v60, 2  ;;  %v887_v55 = vsel %vm277_vm0, %v878_v35, 0.0  ;;  %v399_v57 = vsel %vm277_vm0, %v395_v27, 0.0  ;;  %v2178_v31 = vpop.permute.xlu1 %925  ;;  %v2180_v32 = vpop.permute.xlu0 %923 }
 0x130   : > { %v2145_v58 = vsel %vm505_vm11, %v2013_v49, %v605_v40  ;;  %v380_v42 = vrot.slane %v379_v41, 2  ;;  %v637_v43 = vadd.f32 %v636_v3, %v635_v11  ;;  %v882_v61 = vadd.f32 %v881_v44, %v880_v26 }
 0x131   : > { %v2149_v62 = vsel %vm505_vm11, %v2021_v56, %v612_v14  ;;  %v857_v63 = vadd.f32 %v856_v45, %v855_v24  ;;  %v864_v0 = vadd.f32 %v863_v18, %v862_v25  ;;  %v406_v4 = vsel %vm277_vm0, %v397_v19, 0.0 }
 0x132   : > { %v631_v10 = vrot.slane %v630_v50, 2  ;;  %v888_v12 = vrot.slane %v887_v55, 4  ;;  %v400_v13 = vrot.slane %v399_v57, 4  ;;  %v647_v49 = vsel %vm646_vm5, %v2094_v39, %v2092_v38 }
 0x133   : > { %v374_v15 = vadd.f32 %v373_v54, %v372_v60  ;;  %v648_v56 = vsel %vm646_vm5, %v2092_v38, %v2094_v39  ;;  %v899_v16 = vsel %vm898_vm6, %v2113_v8, %v2111_v7  ;;  %v900_v20 = vsel %vm898_vm6, %v2111_v7, %v2113_v8 }
 0x134   : > { %v381_v21 = vadd.f32 %v380_v42, %v379_v41  ;;  %v638_v22 = vrot.slane %v637_v43, 2  ;;  %v883_v23 = vrot.slane %v882_v61, 2  ;;  %v407_v24 = vrot.slane %v406_v4, 4 }
 0x135   : > { %v651_v51 = vcombine.low %v648_v56, %v647_v49  ;;  %v903_v25 = vcombine.low %v899_v16, %v900_v20  ;;  %v418_v11 = vsel %vm417_vm8, %v414_v37, %v416_v36  ;;  %v419_v38 = vsel %vm417_vm8, %v416_v36, %v414_v37 }
 0x136   : > { %v632_v39 = vadd.f32 %v631_v10, %v630_v50  ;;  %v889_v26 = vadd.f32 %v888_v12, %v887_v55  ;;  %v401_v27 = vadd.f32 %v400_v13, %v399_v57  ;;  %v422_v28 = vcombine.low %v419_v38, %v418_v11 }
 0x137   : > { %v653_v29 = vmul.f32 %v651_v51, %v1968_v2  ;;  %v905_v7 = vmul.f32 %v903_v25, %v1968_v2  ;;  %v676_v8 = vsel %vm675_vm7, %v672_v9, %v674_v6  ;;  %v677_v30 = vsel %vm675_vm7, %v674_v6, %v672_v9  ;;  %v443_v6 = vpop.permute.xlu0 %442 }
 0x138   : > { %v639_v33 = vadd.f32 %v638_v22, %v637_v43  ;;  %v408_v34 = vadd.f32 %v407_v24, %v406_v4  ;;  %v424_v59 = vmul.f32 %v422_v28, %v1968_v2  ;;  %v680_v60 = vcombine.low %v676_v8, %v677_v30  ;;  %v445_v4 = vpop.permute.xlu1 %444 }
 0x139   : > { %v1014_v35 = vsel %vm505_vm11, %v2063_v52, %v857_v63  ;;  %v375_v36 = vrot.slane %v374_v15, 1  ;;  %v884_v37 = vadd.f32 %v883_v23, %v882_v61  ;;  %v657_v40 = vsel %vm277_vm0, %v653_v29, 0.0 }
 0x13a   : > { %v890_v41 = vrot.slane %v889_v26, 2  ;;  %v402_v3 = vrot.slane %v401_v27, 2  ;;  %v655_v44 = vcombine.high %v653_v29, %v653_v29  ;;  %v909_v14 = vsel %vm277_vm0, %v905_v7, 0.0 }
 0x13b   : > { %v382_v45 = vrot.slane %v381_v21, 1  ;;  %v633_v18 = vrot.slane %v632_v39, 1  ;;  %v658_v19 = vrot.slane %v657_v40, 4  ;;  %v682_v50 = vmul.f32 %v680_v60, %v1968_v2  ;;  %v701_v8 = vpop.permute.xlu0 %700 }
 0x13c   : > { %vm927_vm9 = vcmp.lt.s32.totalorder %v1973_v5, 113  ;;  %v640_v54 = vrot.slane %v639_v33, 1  ;;  %v409_v55 = vrot.slane %v408_v34, 2  ;;  %v907_v57 = vcombine.high %v905_v7, %v905_v7  ;;  %v703_v7 = vpop.permute.xlu1 %702 }
 0x13d   : > { %v428_v52 = vsel %vm277_vm0, %v424_v59, 0.0  ;;  %v2192_v42 = vsel %vm505_vm11, %v2071_v17, %v864_v0  ;;  %v376_v43 = vadd.f32 %v375_v36, %v374_v15  ;;  %v910_v61 = vrot.slane %v909_v14, 4 }
 0x13e   : > { %v426_v63 = vcombine.high %v424_v59, %v424_v59  ;;  %v885_v9 = vrot.slane %v884_v37, 1  ;;  %v891_v10 = vadd.f32 %v890_v41, %v889_v26  ;;  %v403_v12 = vadd.f32 %v402_v3, %v401_v27 }
 0x13f   : > { %v664_v13 = vsel %vm277_vm0, %v655_v44, 0.0  ;;  %vm446_vm10 = vcmp.lt.s32.totalorder %v1973_v5, 17  ;;  %v383_v49 = vadd.f32 %v382_v45, %v381_v21  ;;  %v659_v56 = vadd.f32 %v658_v19, %v657_v40 }
 0x140   : > { %v429_v16 = vrot.slane %v428_v52, 4  ;;  %v684_v20 = vcombine.high %v682_v50, %v682_v50  ;;  %vm704_vm13 = vcmp.lt.s32.totalorder %v1973_v5, 95  ;;  %v634_v17 = vadd.f32 %v633_v18, %v632_v39 }
 0x141   : > { %v641_v0 = vadd.f32 %v640_v54, %v639_v33  ;;  %v410_v15 = vadd.f32 %v409_v55, %v408_v34  ;;  %v916_v22 = vsel %vm277_vm0, %v907_v57, 0.0  ;;  %v665_v23 = vrot.slane %v664_v13, 4 }
 0x142   : > { %v911_v24 = vadd.f32 %v910_v61, %v909_v14  ;;  %v435_v51 = vsel %vm277_vm0, %v426_v63, 0.0  ;;  %v686_v25 = vsel %vm277_vm0, %v682_v50, 0.0  ;;  %vm956_vm11 = vcmp.lt.s32.totalorder %v1973_v5, 114 }
 0x143   : > { %v2203_v21 = vsel %vm508_vm12, %v2136_v48, %v376_v43  ;;  %v886_v11 = vadd.f32 %v885_v9, %v884_v37  ;;  %v892_v38 = vrot.slane %v891_v10, 1  ;;  %v404_v26 = vrot.slane %v403_v12, 1  ;;  %v953_v43 = vpop.permute.xlu0 %952 }
 0x144   : > { %v660_v39 = vrot.slane %v659_v56, 2  ;;  %v917_v27 = vrot.slane %v916_v22, 4  ;;  %v430_v28 = vadd.f32 %v429_v16, %v428_v52  ;;  %v693_v29 = vsel %vm277_vm0, %v684_v20, 0.0  ;;  %v955_v52 = vpop.permute.xlu1 %954 }
 0x145   : > { %v510_v30 = vsel %vm508_vm12, %v2139_v53, %v383_v49  ;;  %v411_v33 = vrot.slane %v410_v15, 1  ;;  %v436_v34 = vrot.slane %v435_v51, 4  ;;  %v687_v59 = vrot.slane %v686_v25, 4 }
 0x146   : > { %v2210_v48 = vsel %vm508_vm12, %v2145_v58, %v634_v17  ;;  %v2214_v60 = vsel %vm508_vm12, %v2149_v62, %v641_v0  ;;  %v666_v36 = vadd.f32 %v665_v23, %v664_v13  ;;  %v912_v37 = vrot.slane %v911_v24, 2 }
 0x147   : > { %v893_v40 = vadd.f32 %v892_v38, %v891_v10  ;;  %v2217_v41 = vsel %vm508_vm12, %v1014_v35, %v886_v11  ;;  %v694_v3 = vrot.slane %v693_v29, 4  ;;  %v928_v53 = vsel %vm927_vm9, %v2180_v32, %v2178_v31 }
 0x148   : > { %v405_v44 = vadd.f32 %v404_v26, %v403_v12  ;;  %v661_v14 = vadd.f32 %v660_v39, %v659_v56  ;;  %v918_v58 = vadd.f32 %v917_v27, %v916_v22  ;;  %v431_v45 = vrot.slane %v430_v28, 2 }
 0x149   : > { %v412_v18 = vadd.f32 %v411_v33, %v410_v15  ;;  %v437_v19 = vadd.f32 %v436_v34, %v435_v51  ;;  %v688_v62 = vadd.f32 %v687_v59, %v686_v25  ;;  %v929_v50 = vsel %vm927_vm9, %v2178_v31, %v2180_v32 }
 0x14a   : > { %v667_v35 = vrot.slane %v666_v36, 2  ;;  %v913_v54 = vadd.f32 %v912_v37, %v911_v24  ;;  %v932_v55 = vcombine.low %v928_v53, %v929_v50  ;;  %v447_v57 = vsel %vm446_vm10, %v443_v6, %v445_v4  ;;  %v474_v37 = vpop.permute.xlu1 %473 }
 0x14b   : > { %v695_v61 = vadd.f32 %v694_v3, %v693_v29  ;;  %v448_v63 = vsel %vm446_vm10, %v445_v4, %v443_v6  ;;  %v705_v9 = vsel %vm704_vm13, %v701_v8, %v703_v7  ;;  %v706_v10 = vsel %vm704_vm13, %v703_v7, %v701_v8 }
 0x14c   : > { %vm475_vm14 = vcmp.lt.s32.totalorder %v1973_v5, 18  ;;  %v662_v31 = vrot.slane %v661_v14, 1  ;;  %v919_v32 = vrot.slane %v918_v58, 2  ;;  %v432_v12 = vadd.f32 %v431_v45, %v430_v28 }
 0x14d   : > { %v934_v13 = vmul.f32 %v932_v55, %v1968_v2  ;;  %v438_v49 = vrot.slane %v437_v19, 2  ;;  %v689_v56 = vrot.slane %v688_v62, 2  ;;  %v451_v16 = vcombine.low %v448_v63, %v447_v57 }
 0x14e   : > { %v957_v20 = vsel %vm956_vm11, %v953_v43, %v955_v52  ;;  %v709_v17 = vcombine.low %v705_v9, %v706_v10  ;;  %v958_v0 = vsel %vm956_vm11, %v955_v52, %v953_v43  ;;  %v1017_v15 = vsel %vm508_vm12, %v2192_v42, %v893_v40  ;;  %v472_v40 = vpop.permute.xlu0 %471 }
 0x14f   : > { %v936_v4 = vcombine.high %v934_v13, %v934_v13  ;;  %v938_v6 = vsel %vm277_vm0, %v934_v13, 0.0  ;;  %v668_v22 = vadd.f32 %v667_v35, %v666_v36  ;;  %v696_v23 = vrot.slane %v695_v61, 2 }
 0x150   : > { %v453_v24 = vmul.f32 %v451_v16, %v1968_v2  ;;  %v914_v51 = vrot.slane %v913_v54, 1  ;;  %v920_v25 = vadd.f32 %v919_v32, %v918_v58  ;;  %v433_v11 = vrot.slane %v432_v12, 1 }
 0x151   : > { %v939_v38 = vrot.slane %v938_v6, 4  ;;  %v439_v26 = vadd.f32 %v438_v49, %v437_v19  ;;  %v690_v39 = vadd.f32 %v689_v56, %v688_v62  ;;  %v945_v27 = vsel %vm277_vm0, %v936_v4, 0.0 }
 0x152   : > { %v961_v28 = vcombine.low %v957_v20, %v958_v0  ;;  %v511_v29 = vsel %vm277_vm0, %v2203_v21, %v405_v44  ;;  %v512_v7 = vsel %vm277_vm0, %v510_v30, %v412_v18  ;;  %v663_v8 = vadd.f32 %v662_v31, %v661_v14 }
 0x153   : > { %v711_v42 = vmul.f32 %v709_v17, %v1968_v2  ;;  %v669_v33 = vrot.slane %v668_v22, 1  ;;  %v697_v34 = vadd.f32 %v696_v23, %v695_v61  ;;  %v455_v59 = vcombine.high %v453_v24, %v453_v24  ;;  %v730_v17 = vpop.permute.xlu0 %729 }
 0x154   : > { %v457_v36 = vsel %vm277_vm0, %v453_v24, 0.0  ;;  %v915_v3 = vadd.f32 %v914_v51, %v913_v54  ;;  %v921_v53 = vrot.slane %v920_v25, 1  ;;  %v940_v58 = vadd.f32 %v939_v38, %v938_v6  ;;  %v732_v6 = vpop.permute.xlu1 %731 }
 0x155   : > { %v946_v45 = vrot.slane %v945_v27, 4  ;;  %v434_v19 = vadd.f32 %v433_v11, %v432_v12  ;;  %v440_v62 = vrot.slane %v439_v26, 1  ;;  %v691_v50 = vrot.slane %v690_v39, 1 }
 0x156   : > { %v963_v21 = vmul.f32 %v961_v28, %v1968_v2  ;;  %vm733_vm12 = vcmp.lt.s32.totalorder %v1973_v5, 96  ;;  %v458_v30 = vrot.slane %v457_v36, 4  ;;  %v713_v44 = vcombine.high %v711_v42, %v711_v42 }
 0x157   : > { %v476_v14 = vsel %vm475_vm14, %v472_v40, %v474_v37  ;;  %v477_v18 = vsel %vm475_vm14, %v474_v37, %v472_v40  ;;  %v670_v35 = vadd.f32 %v669_v33, %v668_v22  ;;  %v698_v54 = vrot.slane %v697_v34, 1  ;;  %v982_v40 = vpop.permute.xlu0 %981 }
 0x158   : > { %v464_v55 = vsel %vm277_vm0, %v455_v59, 0.0  ;;  %v715_v57 = vsel %vm277_vm0, %v711_v42, 0.0  ;;  %v766_v52 = vsel %vm277_vm0, %v2210_v48, %v663_v8  ;;  %v922_v43 = vadd.f32 %v921_v53, %v920_v25  ;;  %v984_v37 = vpop.permute.xlu1 %983 }
 0x159   : > { %v941_v61 = vrot.slane %v940_v58, 2  ;;  %v947_v63 = vadd.f32 %v946_v45, %v945_v27  ;;  %v441_v9 = vadd.f32 %v440_v62, %v439_v26  ;;  %v692_v10 = vadd.f32 %v691_v50, %v690_v39 }
 0x15a   : > { %v965_v31 = vcombine.high %v963_v21, %v963_v21  ;;  %v480_v32 = vcombine.low %v477_v18, %v476_v14  ;;  %v459_v12 = vadd.f32 %v458_v30, %v457_v36  ;;  %v465_v13 = vrot.slane %v464_v55, 4 }
 0x15b   : > { %v716_v49 = vrot.slane %v715_v57, 4  ;;  %v722_v56 = vsel %vm277_vm0, %v713_v44, 0.0  ;;  %v767_v16 = vsel %vm277_vm0, %v2214_v60, %v670_v35  ;;  %v1018_v20 = vsel %vm277_vm0, %v2217_v41, %v915_v3 }
 0x15c   : > { %v2267_v48 = vsel %vm513_vm1, %v511_v29, %v434_v19  ;;  %v699_v4 = vadd.f32 %v698_v54, %v697_v34  ;;  %v2270_v0 = vsel %vm277_vm0, %v1017_v15, %v922_v43  ;;  %v942_v22 = vadd.f32 %v941_v61, %v940_v58  ;;  %v1484_v54 = vld [vmem:[%s1896_s10] sm:$0xff]  ;;  %s1349_s10 = sshll.u32 %s1892_s4, 6 }
 0x15d   : > { %v948_v23 = vrot.slane %v947_v63, 2  ;;  %v967_v24 = vsel %vm277_vm0, %v963_v21, 0.0  ;;  %v2274_v51 = vsel %vm513_vm1, %v512_v7, %v441_v9  ;;  %v2277_v60 = vsel %vm513_vm1, %v766_v52, %v692_v10  ;;  %s258_s28 = scalar_lea.vmem [#allocation9], %s1349_s10 }
 0x15e   : > { %v723_v41 = vrot.slane %v722_v56, 4  ;;  %v482_v25 = vmul.f32 %v480_v32, %v1968_v2  ;;  %v460_v11 = vrot.slane %v459_v12, 2  ;;  %v466_v38 = vadd.f32 %v465_v13, %v464_v55  ;;  %s1215_s6 = sshll.u32 %s258_s28, 4  ;;  %s2332_s6 = int_to_ptr.vmem [resolvable:$true] %s1215_s6 }
 0x15f   : > { %v717_v26 = vadd.f32 %v716_v49, %v715_v57  ;;  %v974_v39 = vsel %vm277_vm0, %v965_v31, 0.0  ;;  %v2282_v15 = vsel %vm513_vm1, %v767_v16, %v699_v4  ;;  %v968_v27 = vrot.slane %v967_v24, 4  ;;  %s1573_s7 = scalar_lea.vmem %s2332_s6, 1024  ;;  %p1580_p1 = scmp.lt.s32.totalorder %s2332_s6, %s1578_s19 }
 0x160   : > { %v484_v28 = vcombine.high %v482_v25, %v482_v25  ;;  %v486_v29 = vsel %vm277_vm0, %v482_v25, 0.0  ;;  %v943_v7 = vrot.slane %v942_v22, 1  ;;  %v949_v8 = vadd.f32 %v948_v23, %v947_v63  ;;  %p1574_p12 = scmp.ne.s32.totalorder %s2332_s6, %s1573_s7  ;;  %p1581_p2 = scmp.lt.s32.totalorder %s1579_s5, %s1573_s7 }
 0x161   : > { %v487_v42 = vrot.slane %v486_v29, 4  ;;  %v734_v33 = vsel %vm733_vm12, %v730_v17, %v732_v6  ;;  %v724_v34 = vadd.f32 %v723_v41, %v722_v56  ;;  %v975_v2 = vrot.slane %v974_v39, 4 }
 0x162   : > { %v493_v59 = vsel %vm277_vm0, %v484_v28, 0.0  ;;  %v735_v36 = vsel %vm733_vm12, %v732_v6, %v730_v17  ;;  %v461_v3 = vadd.f32 %v460_v11, %v459_v12  ;;  %v467_v53 = vrot.slane %v466_v38, 2  ;;  %p1575_p5 = pnand %p1574_p12, %p2406_p0  ;;  %p1582_p7 = por %p1581_p2, %p1580_p1 }
 0x163   : > { %v718_v58 = vrot.slane %v717_v26, 2  ;;  %v494_v45 = vrot.slane %v493_v59, 4  ;;  %v969_v19 = vadd.f32 %v968_v27, %v967_v24  ;;  %v488_v62 = vadd.f32 %v487_v42, %v486_v29 }
 0x164   : > { %v738_v50 = vcombine.low %v734_v33, %v735_v36  ;;  %vm985_vm15 = vcmp.lt.s32.totalorder %v1973_v5, 126  ;;  %v944_v21 = vadd.f32 %v943_v7, %v942_v22  ;;  %v950_v30 = vrot.slane %v949_v8, 1  ;;  %p1576_p9 = pneg %p1575_p5 }
 0x165   : > { %v495_v44 = vadd.f32 %v494_v45, %v493_v59  ;;  %v986_v14 = vsel %vm985_vm15, %v982_v40, %v984_v37  ;;  %v725_v18 = vrot.slane %v724_v34, 2  ;;  %v976_v35 = vadd.f32 %v975_v2, %v974_v39 }
 0x166   : > { %v740_v55 = vmul.f32 %v1484_v54, %v738_v50  ;;  %v987_v57 = vsel %vm985_vm15, %v984_v37, %v982_v40  ;;  %v462_v52 = vrot.slane %v461_v3, 1  ;;  %v468_v43 = vadd.f32 %v467_v53, %v466_v38  ;;  %p1583_p4 = pnand %p1582_p7, %p1576_p9 }
 0x167   : > { %v719_v61 = vadd.f32 %v718_v58, %v717_v26  ;;  %v990_v63 = vcombine.low %v986_v14, %v987_v57  ;;  %v970_v9 = vrot.slane %v969_v19, 2  ;;  %v489_v10 = vrot.slane %v488_v62, 2 }
 0x168   : > { %v742_v31 = vcombine.high %v740_v55, %v740_v55  ;;  %v744_v32 = vsel %vm277_vm0, %v740_v55, 0.0  ;;  %v951_v12 = vadd.f32 %v950_v30, %v949_v8  ;;  %v496_v5 = vrot.slane %v495_v44, 2 }
 0x169   : > { %v745_v13 = vrot.slane %v744_v32, 4  ;;  %v992_v49 = vmul.f32 %v1484_v54, %v990_v63  ;;  %v2294_v56 = vsel %vm513_vm1, %v1018_v20, %v944_v21  ;;  %v726_v16 = vadd.f32 %v725_v18, %v724_v34 }
 0x16a   : > { %v977_v4 = vrot.slane %v976_v35, 2  ;;  %v751_v6 = vsel %vm277_vm0, %v742_v31, 0.0  ;;  %v463_v17 = vadd.f32 %v462_v52, %v461_v3  ;;  %v720_v22 = vrot.slane %v719_v61, 1 }
 0x16b   : > { %v746_v23 = vadd.f32 %v745_v13, %v744_v32  ;;  %v752_v24 = vrot.slane %v751_v6, 4  ;;  %v971_v41 = vadd.f32 %v970_v9, %v969_v19  ;;  %v490_v25 = vadd.f32 %v489_v10, %v488_v62 }
 0x16c   : > { %vm1114_vm3 = vcmp.lt.s32.totalorder %v2060_v1, 25  ;;  %v994_v11 = vcombine.high %v992_v49, %v992_v49  ;;  %v996_v38 = vsel %vm277_vm0, %v992_v49, 0.0  ;;  %v469_v26 = vrot.slane %v468_v43, 1  ;;  %v1090_v49 = vld [vmem:[#allocation8] sm:$0xff] }
 0x16d   : > { %v497_v39 = vadd.f32 %v496_v5, %v495_v44  ;;  %v747_v27 = vrot.slane %v746_v23, 2  ;;  %v753_v20 = vadd.f32 %v752_v24, %v751_v6  ;;  %v727_v28 = vrot.slane %v726_v16, 1  ;;  %v1092_v44 = vld [vmem:[#allocation8 + $0x10] sm:$0xff] }
 0x16e   : > { %v978_v29 = vadd.f32 %v977_v4, %v976_v35  ;;  %v997_v7 = vrot.slane %v996_v38, 4  ;;  %v1003_v8 = vsel %vm277_vm0, %v994_v11, 0.0  ;;  %v1021_v42 = vsel %vm513_vm1, %v2270_v0, %v951_v12 }
 0x16f   : > { %v748_v33 = vadd.f32 %v747_v27, %v746_v23  ;;  %v754_v34 = vrot.slane %v753_v20, 2  ;;  %v1004_v2 = vrot.slane %v1003_v8, 4  ;;  %v721_v59 = vadd.f32 %v720_v22, %v719_v61  ;;  %v1093_v61 = vld [vmem:[#allocation8 + $0x18] sm:$0xff]  ;;  %v1091_v23 = vld [vmem:[#allocation8 + $0x8] sm:$0xff] }
 0x170   : > { %v972_v36 = vrot.slane %v971_v41, 1  ;;  %v491_v37 = vrot.slane %v490_v25, 1  ;;  %v998_v40 = vadd.f32 %v997_v7, %v996_v38  ;;  %v498_v3 = vrot.slane %v497_v39, 1 }
 0x171   : > { %v749_v53 = vrot.slane %v748_v33, 1  ;;  %v755_v58 = vadd.f32 %v754_v34, %v753_v20  ;;  %v1005_v45 = vadd.f32 %v1004_v2, %v1003_v8  ;;  %v470_v19 = vadd.f32 %v469_v26, %v468_v43 }
 0x172   : > { %v728_v62 = vadd.f32 %v727_v28, %v726_v16  ;;  %v979_v50 = vrot.slane %v978_v29, 1  ;;  %v999_v21 = vrot.slane %v998_v40, 2  ;;  %v517_v30 = vsel %vm516_vm2, %v2267_v48, %v463_v17  ;;  %v1094_v17 = vld [vmem:[#allocation8 + $0x20] sm:$0xff] }
 0x173   : > { %v750_v0 = vadd.f32 %v749_v53, %v748_v33  ;;  %v756_v14 = vrot.slane %v755_v58, 1  ;;  %v1006_v18 = vrot.slane %v1005_v45, 2  ;;  %v770_v35 = vsel %vm516_vm2, %v2277_v60, %v721_v59 }
 0x174   : > { %v973_v54 = vadd.f32 %v972_v36, %v971_v41  ;;  %v492_v55 = vadd.f32 %v491_v37, %v490_v25  ;;  %v1000_v57 = vadd.f32 %v999_v21, %v998_v40  ;;  %v499_v52 = vadd.f32 %v498_v3, %v497_v39  ;;  %v1095_v41 = vld [vmem:[#allocation8 + $0x28] sm:$0xff] }
 0x175   : > { %v757_v63 = vadd.f32 %v756_v14, %v755_v58  ;;  %v772_v43 = vsel %vm519_vm4, %v770_v35, %v750_v0  ;;  %v1007_v9 = vadd.f32 %v1006_v18, %v1005_v45  ;;  %v771_v10 = vsel %vm516_vm2, %v2282_v15, %v728_v62 }
 0x176   : > { %v980_v48 = vadd.f32 %v979_v50, %v978_v29  ;;  %v1100_v31 = vmul.f32 %v1092_v44, %v772_v43  ;;  %v1001_v32 = vrot.slane %v1000_v57, 1  ;;  %v518_v12 = vsel %vm516_vm2, %v2274_v51, %v470_v19 }
 0x177   : > { %v773_v60 = vsel %vm519_vm4, %v771_v10, %v757_v63  ;;  %v1121_v5 = vsel %vm1114_vm3, %v2131_v46, -1e+30  ;;  %v1008_v13 = vrot.slane %v1007_v9, 1  ;;  %v520_v16 = vsel %vm519_vm4, %v517_v30, %v492_v55 }
 0x178   : > { %v1101_v4 = vmul.f32 %v1093_v61, %v773_v60  ;;  %v1124_v6 = vmax.f32 %v1100_v31, %v1121_v5  ;;  %v1002_v15 = vadd.f32 %v1001_v32, %v1000_v57  ;;  %v1022_v22 = vsel %vm516_vm2, %v2294_v56, %v973_v54 }
 0x179   : > { %v521_v51 = vsel %vm519_vm4, %v518_v12, %v499_v52  ;;  %v1122_v24 = vsel %vm1114_vm3, %v2133_v47, -1e+30  ;;  %v1009_v46 = vadd.f32 %v1008_v13, %v1007_v9  ;;  %v1023_v25 = vsel %vm516_vm2, %v1021_v42, %v980_v48 }
 0x17a   : > { %v1133_v11 = vmax.f32 %v1101_v4, %v1122_v24  ;;  %v1024_v38 = vsel %vm519_vm4, %v1022_v22, %v1002_v15  ;;  %v1098_v26 = vmul.f32 %v1090_v49, %v520_v16  ;;  %v1099_v20 = vmul.f32 %v1091_v23, %v521_v51 }
 0x17b   : > { %v1025_v39 = vsel %vm519_vm4, %v1023_v25, %v1009_v46  ;;  %v1102_v27 = vmul.f32 %v1094_v17, %v1024_v38 }
 0x17c   : > { %v1103_v56 = vmul.f32 %v1095_v41, %v1025_v39 }
 0x17d   : > { %v1123_v28 = vmax.f32 %v1098_v26, %v1102_v27 }
 0x17e   : > { %v1132_v29 = vmax.f32 %v1099_v20, %v1103_v56 }
 0x17f   : > { %v1125_v7 = vmax.f32 %v1123_v28, %v1124_v6 }
 0x180   : > { %v1134_v8 = vmax.f32 %v1132_v29, %v1133_v11 }
 0x181   : > { %v1126_v33 = vrot.slane %v1125_v7, 4 }
 0x182   : > { %v1135_v1 = vrot.slane %v1134_v8, 4 }
 0x183   : > { %v1127_v47 = vmax.f32 %v1125_v7, %v1126_v33 }
 0x184   : > { %v1136_v34 = vmax.f32 %v1134_v8, %v1135_v1 }
 0x185   : > { %v1128_v2 = vrot.slane %v1127_v47, 2 }
 0x186   : > { %v1137_v59 = vrot.slane %v1136_v34, 2 }
 0x187   : > { %v1129_v42 = vmax.f32 %v1127_v47, %v1128_v2 }
 0x188   : > { %v1138_v36 = vmax.f32 %v1136_v34, %v1137_v59 }
 0x189   : > { %v1130_v37 = vrot.slane %v1129_v42, 1 }
 0x18a   : > { %v1139_v40 = vrot.slane %v1138_v36, 1 }
 0x18b   : > { %v1131_v3 = vmax.f32 %v1129_v42, %v1130_v37 }
 0x18c   : > { %v1140_v53 = vmax.f32 %v1138_v36, %v1139_v40 }
 0x18d   : > { %v1141_v58 = vsub.f32 %v1098_v26, %v1131_v3  ;;  %v1143_v45 = vsub.f32 %v1100_v31, %v1131_v3  ;;  %v1145_v19 = vsub.f32 %v1102_v27, %v1131_v3  ;;  %v1147_v62 = vsub.f32 %v1121_v5, %v1131_v3 }
 0x18e   : > { %v1142_v50 = vsub.f32 %v1099_v20, %v1140_v53  ;;  %v1144_v21 = vsub.f32 %v1101_v4, %v1140_v53  ;;  %v1146_v30 = vsub.f32 %v1103_v56, %v1140_v53  ;;  %v1148_v44 = vsub.f32 %v1122_v24, %v1140_v53 }
 0x18f   : > { %v1149_v0 = vmul.f32 1.442695, %v1141_v58  ;;  %v1153_v14 = vmul.f32 1.442695, %v1143_v45  ;;  %v1157_v54 = vmul.f32 1.442695, %v1145_v19 }
 0x190   : > { %v1151_v18 = vmul.f32 1.442695, %v1142_v50  ;;  %v1155_v35 = vmul.f32 1.442695, %v1144_v21  ;;  %v1159_v55 = vmul.f32 1.442695, %v1146_v30 }
 0x191   : > { %1464 = vpow2.f32 %v1149_v0  ;;  %v1161_v57 = vmul.f32 1.442695, %v1147_v62  ;;  %v1163_v52 = vmul.f32 1.442695, %v1148_v44 }
 0x192   : > { %1466 = vpow2.f32 %v1151_v18 }
 0x193   : > { %1468 = vpow2.f32 %v1153_v14 }
 0x194   : > { %1470 = vpow2.f32 %v1155_v35 }
 0x195   : > { %1472 = vpow2.f32 %v1157_v54 }
 0x196   : > { %1474 = vpow2.f32 %v1159_v55 }
 0x197   : > { %1476 = vpow2.f32 %v1161_v57 }
 0x198   : > { %1478 = vpow2.f32 %v1163_v52 }
 0x19b   : > { %v1465_v61 = vpop.eup %1464 }
 0x19c   : > { %v1467_v63 = vpop.eup %1466 }
 0x19d   : > { %v1469_v43 = vpop.eup %1468 }
 0x19e   : > { %v1471_v9 = vpop.eup %1470  ;;  %v1165_v10 = vadd.f32 %v1469_v43, %v1465_v61 }
 0x19f   : > { %v1473_v48 = vpop.eup %1472  ;;  %v1174_v31 = vadd.f32 %v1471_v9, %v1467_v63 }
 0x1a0   : > { %v1475_v32 = vpop.eup %1474  ;;  %v1166_v12 = vadd.f32 %v1473_v48, %v1165_v10 }
 0x1a1   : > { %v1477_v60 = vpop.eup %1476  ;;  %v1175_v5 = vadd.f32 %v1475_v32, %v1174_v31 }
 0x1a2   : > { %v1479_v13 = vpop.eup %1478  ;;  %v1167_v49 = vadd.f32 %v1477_v60, %v1166_v12 }
 0x1a3   : > { %v1176_v16 = vadd.f32 %v1479_v13, %v1175_v5 }
 0x1a4   : > { %v1168_v4 = vrot.slane %v1167_v49, 4 }
 0x1a5   : > { %v1177_v6 = vrot.slane %v1176_v16, 4 }
 0x1a6   : > { %v1169_v17 = vadd.f32 %v1168_v4, %v1167_v49 }
 0x1a7   : > { %v1178_v15 = vadd.f32 %v1177_v6, %v1176_v16 }
 0x1a8   : > { %v1170_v22 = vrot.slane %v1169_v17, 2 }
 0x1a9   : > { %v1179_v23 = vrot.slane %v1178_v15, 2 }
 0x1aa   : > { %v1171_v51 = vadd.f32 %v1170_v22, %v1169_v17 }
 0x1ab   : > { %v1180_v24 = vadd.f32 %v1179_v23, %v1178_v15 }
 0x1ac   : > { %v1172_v41 = vrot.slane %v1171_v51, 1 }
 0x1ad   : > { %v1181_v46 = vrot.slane %v1180_v24, 1 }
 0x1ae   : > { %v1173_v25 = vadd.f32 %v1172_v41, %v1171_v51 }
 0x1af   : > { %v1182_v11 = vadd.f32 %v1181_v46, %v1180_v24 }
 0x1b0   : > { %1480 = vrcp.f32 %v1173_v25 }
 0x1b1   : > { %1482 = vrcp.f32 %v1182_v11 }
 0x1ba   : > { %v1481_v38 = vpop.eup %1480 }
 0x1bb   : > { %v1483_v26 = vpop.eup %1482  ;;  %v1184_v39 = vmul.f32 %v1481_v38, %v1465_v61  ;;  %v1187_v27 = vmul.f32 %v1481_v38, %v1469_v43  ;;  %v1189_v20 = vmul.f32 %v1481_v38, %v1473_v48  ;;  %v1191_v56 = vmul.f32 %v1481_v38, %v1477_v60 }
 0x1bc   : > { %v1186_v28 = vmul.f32 %v1483_v26, %v1467_v63  ;;  %v1188_v29 = vmul.f32 %v1483_v26, %v1471_v9  ;;  %v1190_v7 = vmul.f32 %v1483_v26, %v1475_v32  ;;  %v1192_v8 = vmul.f32 %v1483_v26, %v1479_v13 }
 0x1bd   : > { %1197 = vst [vmem:[%s258_s28 + $0x20] sm:$0xff] %v1189_v20  ;;  %1193 = vst [vmem:[%s258_s28] sm:$0xff] %v1184_v39 }
 0x1be   : > { %1195 = vst [vmem:[%s258_s28 + $0x10] sm:$0xff] %v1187_v27  ;;  %1199 = vst [vmem:[%s258_s28 + $0x30] sm:$0xff] %v1191_v56 }
 0x1bf   : > { %1198 = vst [vmem:[%s258_s28 + $0x28] sm:$0xff] %v1190_v7  ;;  %1194 = vst [vmem:[%s258_s28 + $0x8] sm:$0xff] %v1186_v28 }
 0x1c0   : > { %1196 = vst [vmem:[%s258_s28 + $0x18] sm:$0xff] %v1188_v29  ;;  %1200 = vst [vmem:[%s258_s28 + $0x38] sm:$0xff] %v1192_v8 }
 0x1c1   : > { %1586 = shalt.err (!%p1583_p4)
}
 0x1c2   : > { %s1587_s23 = scalar_lea.hbm %s2330_s2, 1024  ;;  %s1591_s24 = scalar_lea.hbm %s2385_s3, 2048 }
 0x1c3   : > { %p1588_p8 = scmp.ne.s32.totalorder %s2330_s2, %s1587_s23  ;;  %p1592_p10 = scmp.lt.u32.totalorder %s2330_s2, %s2385_s3 }
 0x1c4   : > { %p1593_p13 = scmp.lt.u32.totalorder %s1591_s24, %s1587_s23  ;;  %p1595_p12 = scmp.lt.u32.totalorder %s1587_s23, %s2330_s2 }
 0x1c5   : > { %p1589_p11 = pnand %p1588_p8, %p2406_p0 }
 0x1c6   : > { %p1594_p3 = por %p1593_p13, %p1592_p10 }
 0x1c7   : > { %p1590_p6 = pneg %p1589_p11 }
 0x1c8   : > { %p1596_p5 = por %p1595_p12, %p1594_p3 }
 0x1ca   : > { %p1597_p9 = pnand %p1596_p5, %p1590_p6 }
 0x1cc   : > { %1600 = shalt.err (!%p1597_p9)
}
 0x1cd   : > { %s1695_s10 = smov 256  }
 0x1ce   : > { %1366 = dma.vmem_to_hbm [thread:$0]  (%p2406_p0), %s2332_s6, 1024, %s2330_s2, %s1202_s15, %s1695_s10, %s1695_s10, %s1685_s22  }
 0x1cf PF: > { %s1230_s26 = sand.u32 1, %s1643_s12   ;;  %p2407_p1 = scmp.ne.s32.totalorder %s2393_s21, 0 }
 0x1d0   : > { %p2408_p2 = scmp.ge.s32.totalorder %s1663_s17, 2  ;;  %s1231_s28 = scalar_lea.sflag [#allocation5], %s1230_s26 }
 0x1d2   : > { %p1380_p7 = pnand %p2408_p2, %p2407_p1 }
 0x1d4   : > { %1638 = dma.done.wait (!%p1380_p7), %s1231_s28, 1024  }
 0x1d5   : > { %1640 = vsyncadd (!%p1380_p7), %s1231_s28, 4294966272  ;;  %s22_s17 = sadd.s32 1, %s1663_s17   ;;  %s2409_s25 = sld [smem:[#allocation14_spill]] }
 0x1d6   : > { %p19_p4 = scmp.ge.s32.totalorder %s22_s17, 4   ;;  %s2410_s12 = smov %s1647_s13 }
 0x1d7   : > { %s2411_s13 = smov %s1651_s14  ;;  %s2412_s14 = smov %s1819_s29 }
 0x1d8   : > { %s2413_s15 = smov %s1659_s16  ;;  %21 = sbr.rel (!%p19_p4) target bundleno = 10 (0xa), region = 102 }
 0x1db   : > { %s2414_s16 = smov %s2409_s25 }
 0x1df   :  { %1236 = vsyncpa [#allocation4], 1 }
 0x1e0   :  { %1238 = vsyncpa [#allocation4 + $0x1], 1 }
 0x1e1   :  { %1239 = vsyncpa [#allocation7], 1 }
 0x1e2   :  { %1241 = vsyncpa [#allocation7 + $0x1], 1 }
 0x1e3   :  { %1242 = vsyncpa [#allocation5], 1 }
 0x1e4   :  { %1244 = vsyncpa [#allocation5 + $0x1], 1 }

</bundles_post_ra>
